<compile_context>
chip_gen: v6e
topology: v6e:2x2x1
jax: 0.10.0
libtpu: 0.0.40
codegen_flags: <defaults>
</compile_context>

<pallas_src>
import functools

import jax
import jax.numpy as jnp
from jax.experimental import pallas as pl
from jax.experimental.pallas import tpu as pltpu


def _round_up(x, m):
    return (x + m - 1) // m * m


def _pick_tm(m):
    """Lane-axis tile size for the M (=N*Hp*Wp) dimension.

    Multiples of 128 (unmasked stores; grid >= 2 where it matters for
    megacore) with bounded padding; full extent for tiny late stages.
    """
    if m <= 128:
        return m                                   # single full-extent tile
    if m <= 1024:
        return _round_up((m + 1) // 2, 128)        # two lane-aligned tiles
    for tm in (512, 384, 256):
        if ((-m) % tm) * 8 <= m:                   # padding overhead <= 12.5%
            return tm
    return 128


# ---------------------------------------------------------------------------
# Pallas kernels
# ---------------------------------------------------------------------------
def _stage_kernel(p_ref, w_ref, b_ref, scale_ref, shift_ref, o_ref):
    """Fused conv(matmul) + maxpool + bias + ReLU + BatchNorm(affine) tile.

    Lane-dense: output positions M live on the lane axis.
      p_ref:     (pp, K, TM)  bf16 im2col patches, one slab per pool offset
      w_ref:     (Cout, K)    bf16 conv weight (flattened)
      b_ref:     (Cout, 1)    f32  conv bias
      scale_ref: (Cout, 1)    f32  gamma / sqrt(running_var + eps)
      shift_ref: (Cout, 1)    f32  beta - running_mean * scale
      o_ref:     (Cout, TM)   f32
    """
    w = w_ref[...]                                  # hoisted out of pp loop
    acc = jnp.dot(w, p_ref[0], preferred_element_type=jnp.float32)
    for k in range(1, p_ref.shape[0]):
        acc = jnp.maximum(
            acc, jnp.dot(w, p_ref[k], preferred_element_type=jnp.float32))
    # max-pool commutes with the monotone per-channel bias-add + ReLU
    y = jnp.maximum(acc + b_ref[...], 0.0)
    o_ref[...] = y * scale_ref[...] + shift_ref[...]


# ---------------------------------------------------------------------------
# Glue (pure JAX): im2col grouped by pool-window offset, channels-first layout
# ---------------------------------------------------------------------------
def _im2col_cf(x, kh, kw, ph, pw):
    """x: (Cin, N, H, W) -> P: (pp, K, M), K=(ci,dh,dw), M=(n,yp,xp)."""
    Cin, N, H, W = x.shape
    Hc, Wc = H - kh + 1, W - kw + 1
    Hp, Wp = Hc // ph, Wc // pw
    slabs = []
    for a in range(ph):
        for b in range(pw):
            taps = []
            for dh in range(kh):
                for dw in range(kw):
                    sl = x[:, :,
                           a + dh: a + dh + ph * Hp: ph,
                           b + dw: b + dw + pw * Wp: pw]  # (Cin, N, Hp, Wp)
                    taps.append(sl)
            t = jnp.stack(taps, axis=1)            # (Cin, kh*kw, N, Hp, Wp)
            slabs.append(t.reshape(Cin * kh * kw, N * Hp * Wp))
    P = jnp.stack(slabs, axis=0)                   # (pp, K, M)
    return P, (N, Hp, Wp)


def conv_stage(x, w, b, gamma, beta, rmean, rvar, *, pool, eps=1e-5):
    """conv -> ReLU -> maxpool -> BatchNorm (eval).

    x: channels-first (Cin, N, H, W); returns (Cout, N, Hp, Wp).
    """
    Cout, Cin, kh, kw = w.shape
    ph, pw = pool

    xb = x.astype(jnp.bfloat16)
    P, (N, Hp, Wp) = _im2col_cf(xb, kh, kw, ph, pw)
    pp, K, M = P.shape

    TM = _pick_tm(M)
    Mpad = _round_up(M, TM)
    if Mpad != M:
        P = jnp.pad(P, ((0, 0), (0, 0), (0, Mpad - M)))

    w2 = w.reshape(Cout, Cin * kh * kw).astype(jnp.bfloat16)   # (Cout, K)
    scale = gamma / jnp.sqrt(rvar + eps)
    shift = beta - rmean * scale

    out = pl.pallas_call(
        _stage_kernel,
        out_shape=jax.ShapeDtypeStruct((Cout, Mpad), jnp.float32),
        grid_spec=pltpu.PrefetchScalarGridSpec(
            num_scalar_prefetch=0,
            grid=(Mpad // TM,),
            in_specs=[
                pl.BlockSpec((pp, K, TM), lambda i: (0, 0, i)),
                pl.BlockSpec((Cout, K), lambda i: (0, 0)),
                pl.BlockSpec((Cout, 1), lambda i: (0, 0)),
                pl.BlockSpec((Cout, 1), lambda i: (0, 0)),
                pl.BlockSpec((Cout, 1), lambda i: (0, 0)),
            ],
            out_specs=pl.BlockSpec((Cout, TM), lambda i: (0, i)),
        ),
        compiler_params=pltpu.CompilerParams(
            dimension_semantics=("parallel",)),
    )(P, w2, b.reshape(Cout, 1), scale.reshape(Cout, 1),
      shift.reshape(Cout, 1))

    # Padded lane columns are garbage; slice before reshaping back.
    return out[:, :M].reshape(Cout, N, Hp, Wp)


# ---------------------------------------------------------------------------
# Parameters (deterministic, PyTorch-default-style init) and full forward
# ---------------------------------------------------------------------------
_CONV_DEFS = [
    ("conv1", 1, 8, (1, 2)), ("conv2", 8, 8, (1, 2)),
    ("conv3", 8, 16, (1, 2)), ("conv4", 16, 16, (1, 2)),
    ("conv5", 16, 32, (2, 2)), ("conv6", 32, 32, (2, 2)),
]
_POOLS = [(1, 2), (1, 2), (1, 2), (1, 2), (2, 2), (2, 2)]
FC_IN = 32 * 7 * 6  # 1344


def init_params(key):
    params = {}
    for name, cin, cout, (kh, kw) in _CONV_DEFS:
        key, k1, k2 = jax.random.split(key, 3)
        bound = 1.0 / float((cin * kh * kw) ** 0.5)
        params[name + "_w"] = jax.random.uniform(
            k1, (cout, cin, kh, kw), jnp.float32, -bound, bound)
        params[name + "_b"] = jax.random.uniform(
            k2, (cout,), jnp.float32, -bound, bound)
        params[name + "_gamma"] = jnp.ones((cout,), jnp.float32)
        params[name + "_beta"] = jnp.zeros((cout,), jnp.float32)
        params[name + "_rmean"] = jnp.zeros((cout,), jnp.float32)
        params[name + "_rvar"] = jnp.ones((cout,), jnp.float32)
    key, k1, k2 = jax.random.split(key, 3)
    bound = 1.0 / float(FC_IN ** 0.5)
    params["fc_w"] = jax.random.uniform(k1, (FC_IN, 1), jnp.float32,
                                        -bound, bound)
    params["fc_b"] = jax.random.uniform(k2, (1,), jnp.float32, -bound, bound)
    return params


def cnn_forward(params, x):
    # NCHW -> channels-first (C, N, H, W) once; stays channels-first between
    # stages (no per-stage NCHW<->NHWC round trip).
    xc = jnp.transpose(x, (1, 0, 2, 3))
    for (name, _, _, _), pool in zip(_CONV_DEFS, _POOLS):
        xc = conv_stage(
            xc, params[name + "_w"], params[name + "_b"],
            params[name + "_gamma"], params[name + "_beta"],
            params[name + "_rmean"], params[name + "_rvar"], pool=pool)
    # dropout (eval mode) = identity
    N = xc.shape[1]
    # torch .view(-1, fc_in) flattens each sample in (c, y, x) order:
    feats = jnp.transpose(xc, (1, 0, 2, 3)).reshape(N, FC_IN)
    # Final 1-wide FC + ReLU in plain JAX (Pallas kernel here is pure launch
    # overhead plus a degenerate single-lane masked store).
    return jnp.maximum(feats @ params["fc_w"] + params["fc_b"], 0.0)


if __name__ == "__main__":
    key = jax.random.PRNGKey(0)
    pkey, xkey = jax.random.split(key)
    params = init_params(pkey)
    # Smallest NCHW input consistent with fc_in = 32*7*6 after the 6 stages.
    x = jax.random.normal(xkey, (2, 1, 31, 447), jnp.float32)
    out = jax.jit(functools.partial(cnn_forward, params))(x)
    out = jax.block_until_ready(out)
    assert out.shape == (2, 1), out.shape
    assert bool(jnp.all(jnp.isfinite(out)))
    assert bool(jnp.all(out >= 0.0))  # final ReLU
    print("KERNEL_OK")
</pallas_src>

<mosaic_0001>
module attributes {stable_mosaic.version = 11 : i64} {
  func.func @_stage_kernel(%arg0: i32, %arg1: memref<2x2x512xbf16, #tpu.memory_space<vmem>>, %arg2: memref<8x2xbf16, #tpu.memory_space<vmem>>, %arg3: memref<8x1xf32, #tpu.memory_space<vmem>>, %arg4: memref<8x1xf32, #tpu.memory_space<vmem>>, %arg5: memref<8x1xf32, #tpu.memory_space<vmem>>, %arg6: memref<8x512xf32, #tpu.memory_space<vmem>>) attributes {dimension_semantics = [#tpu.dimension_semantics<parallel>], iteration_bounds = array<i64: 28>, scalar_prefetch = 0 : i64, scratch_operands = 0 : i64, tpu.core_type = #tpu.core_type<tc>, window_params = [{transform_indices = @transform_0, window_bounds = array<i64: 2, 2, 512>}, {pipeline_mode = #tpu.pipeline_mode<synchronous>, transform_indices = @transform_1, window_bounds = array<i64: 8, 2>}, {pipeline_mode = #tpu.pipeline_mode<synchronous>, transform_indices = @transform_2, window_bounds = array<i64: 8, 1>}, {pipeline_mode = #tpu.pipeline_mode<synchronous>, transform_indices = @transform_3, window_bounds = array<i64: 8, 1>}, {pipeline_mode = #tpu.pipeline_mode<synchronous>, transform_indices = @transform_4, window_bounds = array<i64: 8, 1>}, {transform_indices = @transform_5, window_bounds = array<i64: 8, 512>}]} {
    %c0 = arith.constant 0 : index
    %c0_0 = arith.constant 0 : index
    %0 = vector.load %arg2[%c0, %c0_0] : memref<8x2xbf16, #tpu.memory_space<vmem>>, vector<8x2xbf16>
    %c0_1 = arith.constant 0 : index
    %c0_2 = arith.constant 0 : index
    %c0_3 = arith.constant 0 : index
    %1 = vector.load %arg1[%c0_1, %c0_2, %c0_3] : memref<2x2x512xbf16, #tpu.memory_space<vmem>>, vector<1x2x512xbf16>
    %2 = vector.shape_cast %1 : vector<1x2x512xbf16> to vector<2x512xbf16>
    %cst = arith.constant dense<0.000000e+00> : vector<8x512xf32>
    %3 = tpu.matmul %0, %2, %cst {dimension_numbers = #tpu.dot_dimension_numbers<[1], [0], [0], [1], [0, 0, 1, 1], [], []>} : vector<8x2xbf16>, vector<2x512xbf16>, vector<8x512xf32> -> vector<8x512xf32>
    %c1 = arith.constant 1 : index
    %c0_4 = arith.constant 0 : index
    %c0_5 = arith.constant 0 : index
    %4 = vector.load %arg1[%c1, %c0_4, %c0_5] : memref<2x2x512xbf16, #tpu.memory_space<vmem>>, vector<1x2x512xbf16>
    %5 = vector.shape_cast %4 : vector<1x2x512xbf16> to vector<2x512xbf16>
    %cst_6 = arith.constant dense<0.000000e+00> : vector<8x512xf32>
    %6 = tpu.matmul %0, %5, %cst_6 {dimension_numbers = #tpu.dot_dimension_numbers<[1], [0], [0], [1], [0, 0, 1, 1], [], []>} : vector<8x2xbf16>, vector<2x512xbf16>, vector<8x512xf32> -> vector<8x512xf32>
    %7 = arith.maximumf %3, %6 : vector<8x512xf32>
    %c0_7 = arith.constant 0 : index
    %c0_8 = arith.constant 0 : index
    %8 = vector.load %arg3[%c0_7, %c0_8] : memref<8x1xf32, #tpu.memory_space<vmem>>, vector<8x1xf32>
    %9 = vector.broadcast %8 : vector<8x1xf32> to vector<8x512xf32>
    %10 = arith.addf %7, %9 : vector<8x512xf32>
    %cst_9 = arith.constant 0.000000e+00 : f32
    %11 = vector.broadcast %cst_9 : f32 to vector<8x512xf32>
    %12 = arith.maximumf %10, %11 : vector<8x512xf32>
    %c0_10 = arith.constant 0 : index
    %c0_11 = arith.constant 0 : index
    %13 = vector.load %arg4[%c0_10, %c0_11] : memref<8x1xf32, #tpu.memory_space<vmem>>, vector<8x1xf32>
    %14 = vector.broadcast %13 : vector<8x1xf32> to vector<8x512xf32>
    %15 = arith.mulf %12, %14 : vector<8x512xf32>
    %c0_12 = arith.constant 0 : index
    %c0_13 = arith.constant 0 : index
    %16 = vector.load %arg5[%c0_12, %c0_13] : memref<8x1xf32, #tpu.memory_space<vmem>>, vector<8x1xf32>
    %17 = vector.broadcast %16 : vector<8x1xf32> to vector<8x512xf32>
    %18 = arith.addf %15, %17 : vector<8x512xf32>
    %c0_14 = arith.constant 0 : index
    %c0_15 = arith.constant 0 : index
    %19 = vector.load %arg6[%c0_14, %c0_15] : memref<8x512xf32, #tpu.memory_space<vmem>>, vector<8x512xf32>
    tpu.vector_store %arg6[%c0_14, %c0_15], %18 {strides = array<i32>} : memref<8x512xf32, #tpu.memory_space<vmem>>, vector<8x512xf32>,
    return
  }
  func.func @transform_0(%arg0: i32) -> (i32, i32, i32) {
    %c0_i32 = arith.constant 0 : i32
    %c0_i32_0 = arith.constant 0 : i32
    %c0_i32_1 = arith.constant 0 : i32
    return %c0_i32, %c0_i32_0, %arg0 : i32, i32, i32
  }
  func.func @transform_1(%arg0: i32) -> (i32, i32) {
    %c0_i32 = arith.constant 0 : i32
    %c0_i32_0 = arith.constant 0 : i32
    %c0_i32_1 = arith.constant 0 : i32
    return %c0_i32, %c0_i32_0 : i32, i32
  }
  func.func @transform_2(%arg0: i32) -> (i32, i32) {
    %c0_i32 = arith.constant 0 : i32
    %c0_i32_0 = arith.constant 0 : i32
    %c0_i32_1 = arith.constant 0 : i32
    return %c0_i32, %c0_i32_0 : i32, i32
  }
  func.func @transform_3(%arg0: i32) -> (i32, i32) {
    %c0_i32 = arith.constant 0 : i32
    %c0_i32_0 = arith.constant 0 : i32
    %c0_i32_1 = arith.constant 0 : i32
    return %c0_i32, %c0_i32_0 : i32, i32
  }
  func.func @transform_4(%arg0: i32) -> (i32, i32) {
    %c0_i32 = arith.constant 0 : i32
    %c0_i32_0 = arith.constant 0 : i32
    %c0_i32_1 = arith.constant 0 : i32
    return %c0_i32, %c0_i32_0 : i32, i32
  }
  func.func @transform_5(%arg0: i32) -> (i32, i32) {
    %c0_i32 = arith.constant 0 : i32
    %c0_i32_0 = arith.constant 0 : i32
    return %c0_i32, %arg0 : i32, i32
  }
}

module attributes {stable_mosaic.version = 11 : i64} {
  func.func @_stage_kernel(%arg0: i32, %arg1: memref<2x16x512xbf16, #tpu.memory_space<vmem>>, %arg2: memref<8x16xbf16, #tpu.memory_space<vmem>>, %arg3: memref<8x1xf32, #tpu.memory_space<vmem>>, %arg4: memref<8x1xf32, #tpu.memory_space<vmem>>, %arg5: memref<8x1xf32, #tpu.memory_space<vmem>>, %arg6: memref<8x512xf32, #tpu.memory_space<vmem>>) attributes {dimension_semantics = [#tpu.dimension_semantics<parallel>], iteration_bounds = array<i64: 14>, scalar_prefetch = 0 : i64, scratch_operands = 0 : i64, tpu.core_type = #tpu.core_type<tc>, window_params = [{transform_indices = @transform_0, window_bounds = array<i64: 2, 16, 512>}, {pipeline_mode = #tpu.pipeline_mode<synchronous>, transform_indices = @transform_1, window_bounds = array<i64: 8, 16>}, {pipeline_mode = #tpu.pipeline_mode<synchronous>, transform_indices = @transform_2, window_bounds = array<i64: 8, 1>}, {pipeline_mode = #tpu.pipeline_mode<synchronous>, transform_indices = @transform_3, window_bounds = array<i64: 8, 1>}, {pipeline_mode = #tpu.pipeline_mode<synchronous>, transform_indices = @transform_4, window_bounds = array<i64: 8, 1>}, {transform_indices = @transform_5, window_bounds = array<i64: 8, 512>}]} {
    %c0 = arith.constant 0 : index
    %c0_0 = arith.constant 0 : index
    %0 = vector.load %arg2[%c0, %c0_0] : memref<8x16xbf16, #tpu.memory_space<vmem>>, vector<8x16xbf16>
    %c0_1 = arith.constant 0 : index
    %c0_2 = arith.constant 0 : index
    %c0_3 = arith.constant 0 : index
    %1 = vector.load %arg1[%c0_1, %c0_2, %c0_3] : memref<2x16x512xbf16, #tpu.memory_space<vmem>>, vector<1x16x512xbf16>
    %2 = vector.shape_cast %1 : vector<1x16x512xbf16> to vector<16x512xbf16>
    %cst = arith.constant dense<0.000000e+00> : vector<8x512xf32>
    %3 = tpu.matmul %0, %2, %cst {dimension_numbers = #tpu.dot_dimension_numbers<[1], [0], [0], [1], [0, 0, 1, 1], [], []>} : vector<8x16xbf16>, vector<16x512xbf16>, vector<8x512xf32> -> vector<8x512xf32>
    %c1 = arith.constant 1 : index
    %c0_4 = arith.constant 0 : index
    %c0_5 = arith.constant 0 : index
    %4 = vector.load %arg1[%c1, %c0_4, %c0_5] : memref<2x16x512xbf16, #tpu.memory_space<vmem>>, vector<1x16x512xbf16>
    %5 = vector.shape_cast %4 : vector<1x16x512xbf16> to vector<16x512xbf16>
    %cst_6 = arith.constant dense<0.000000e+00> : vector<8x512xf32>
    %6 = tpu.matmul %0, %5, %cst_6 {dimension_numbers = #tpu.dot_dimension_numbers<[1], [0], [0], [1], [0, 0, 1, 1], [], []>} : vector<8x16xbf16>, vector<16x512xbf16>, vector<8x512xf32> -> vector<8x512xf32>
    %7 = arith.maximumf %3, %6 : vector<8x512xf32>
    %c0_7 = arith.constant 0 : index
    %c0_8 = arith.constant 0 : index
    %8 = vector.load %arg3[%c0_7, %c0_8] : memref<8x1xf32, #tpu.memory_space<vmem>>, vector<8x1xf32>
    %9 = vector.broadcast %8 : vector<8x1xf32> to vector<8x512xf32>
    %10 = arith.addf %7, %9 : vector<8x512xf32>
    %cst_9 = arith.constant 0.000000e+00 : f32
    %11 = vector.broadcast %cst_9 : f32 to vector<8x512xf32>
    %12 = arith.maximumf %10, %11 : vector<8x512xf32>
    %c0_10 = arith.constant 0 : index
    %c0_11 = arith.constant 0 : index
    %13 = vector.load %arg4[%c0_10, %c0_11] : memref<8x1xf32, #tpu.memory_space<vmem>>, vector<8x1xf32>
    %14 = vector.broadcast %13 : vector<8x1xf32> to vector<8x512xf32>
    %15 = arith.mulf %12, %14 : vector<8x512xf32>
    %c0_12 = arith.constant 0 : index
    %c0_13 = arith.constant 0 : index
    %16 = vector.load %arg5[%c0_12, %c0_13] : memref<8x1xf32, #tpu.memory_space<vmem>>, vector<8x1xf32>
    %17 = vector.broadcast %16 : vector<8x1xf32> to vector<8x512xf32>
    %18 = arith.addf %15, %17 : vector<8x512xf32>
    %c0_14 = arith.constant 0 : index
    %c0_15 = arith.constant 0 : index
    %19 = vector.load %arg6[%c0_14, %c0_15] : memref<8x512xf32, #tpu.memory_space<vmem>>, vector<8x512xf32>
    tpu.vector_store %arg6[%c0_14, %c0_15], %18 {strides = array<i32>} : memref<8x512xf32, #tpu.memory_space<vmem>>, vector<8x512xf32>,
    return
  }
  func.func @transform_0(%arg0: i32) -> (i32, i32, i32) {
    %c0_i32 = arith.constant 0 : i32
    %c0_i32_0 = arith.constant 0 : i32
    %c0_i32_1 = arith.constant 0 : i32
    return %c0_i32, %c0_i32_0, %arg0 : i32, i32, i32
  }
  func.func @transform_1(%arg0: i32) -> (i32, i32) {
    %c0_i32 = arith.constant 0 : i32
    %c0_i32_0 = arith.constant 0 : i32
    %c0_i32_1 = arith.constant 0 : i32
    return %c0_i32, %c0_i32_0 : i32, i32
  }
  func.func @transform_2(%arg0: i32) -> (i32, i32) {
    %c0_i32 = arith.constant 0 : i32
    %c0_i32_0 = arith.constant 0 : i32
    %c0_i32_1 = arith.constant 0 : i32
    return %c0_i32, %c0_i32_0 : i32, i32
  }
  func.func @transform_3(%arg0: i32) -> (i32, i32) {
    %c0_i32 = arith.constant 0 : i32
    %c0_i32_0 = arith.constant 0 : i32
    %c0_i32_1 = arith.constant 0 : i32
    return %c0_i32, %c0_i32_0 : i32, i32
  }
  func.func @transform_4(%arg0: i32) -> (i32, i32) {
    %c0_i32 = arith.constant 0 : i32
    %c0_i32_0 = arith.constant 0 : i32
    %c0_i32_1 = arith.constant 0 : i32
    return %c0_i32, %c0_i32_0 : i32, i32
  }
  func.func @transform_5(%arg0: i32) -> (i32, i32) {
    %c0_i32 = arith.constant 0 : i32
    %c0_i32_0 = arith.constant 0 : i32
    return %c0_i32, %arg0 : i32, i32
  }
}

module attributes {stable_mosaic.version = 11 : i64} {
  func.func @_stage_kernel(%arg0: i32, %arg1: memref<2x16x512xbf16, #tpu.memory_space<vmem>>, %arg2: memref<16x16xbf16, #tpu.memory_space<vmem>>, %arg3: memref<16x1xf32, #tpu.memory_space<vmem>>, %arg4: memref<16x1xf32, #tpu.memory_space<vmem>>, %arg5: memref<16x1xf32, #tpu.memory_space<vmem>>, %arg6: memref<16x512xf32, #tpu.memory_space<vmem>>) attributes {dimension_semantics = [#tpu.dimension_semantics<parallel>], iteration_bounds = array<i64: 7>, scalar_prefetch = 0 : i64, scratch_operands = 0 : i64, tpu.core_type = #tpu.core_type<tc>, window_params = [{transform_indices = @transform_0, window_bounds = array<i64: 2, 16, 512>}, {pipeline_mode = #tpu.pipeline_mode<synchronous>, transform_indices = @transform_1, window_bounds = array<i64: 16, 16>}, {pipeline_mode = #tpu.pipeline_mode<synchronous>, transform_indices = @transform_2, window_bounds = array<i64: 16, 1>}, {pipeline_mode = #tpu.pipeline_mode<synchronous>, transform_indices = @transform_3, window_bounds = array<i64: 16, 1>}, {pipeline_mode = #tpu.pipeline_mode<synchronous>, transform_indices = @transform_4, window_bounds = array<i64: 16, 1>}, {transform_indices = @transform_5, window_bounds = array<i64: 16, 512>}]} {
    %c0 = arith.constant 0 : index
    %c0_0 = arith.constant 0 : index
    %0 = vector.load %arg2[%c0, %c0_0] : memref<16x16xbf16, #tpu.memory_space<vmem>>, vector<16x16xbf16>
    %c0_1 = arith.constant 0 : index
    %c0_2 = arith.constant 0 : index
    %c0_3 = arith.constant 0 : index
    %1 = vector.load %arg1[%c0_1, %c0_2, %c0_3] : memref<2x16x512xbf16, #tpu.memory_space<vmem>>, vector<1x16x512xbf16>
    %2 = vector.shape_cast %1 : vector<1x16x512xbf16> to vector<16x512xbf16>
    %cst = arith.constant dense<0.000000e+00> : vector<16x512xf32>
    %3 = tpu.matmul %0, %2, %cst {dimension_numbers = #tpu.dot_dimension_numbers<[1], [0], [0], [1], [0, 0, 1, 1], [], []>} : vector<16x16xbf16>, vector<16x512xbf16>, vector<16x512xf32> -> vector<16x512xf32>
    %c1 = arith.constant 1 : index
    %c0_4 = arith.constant 0 : index
    %c0_5 = arith.constant 0 : index
    %4 = vector.load %arg1[%c1, %c0_4, %c0_5] : memref<2x16x512xbf16, #tpu.memory_space<vmem>>, vector<1x16x512xbf16>
    %5 = vector.shape_cast %4 : vector<1x16x512xbf16> to vector<16x512xbf16>
    %cst_6 = arith.constant dense<0.000000e+00> : vector<16x512xf32>
    %6 = tpu.matmul %0, %5, %cst_6 {dimension_numbers = #tpu.dot_dimension_numbers<[1], [0], [0], [1], [0, 0, 1, 1], [], []>} : vector<16x16xbf16>, vector<16x512xbf16>, vector<16x512xf32> -> vector<16x512xf32>
    %7 = arith.maximumf %3, %6 : vector<16x512xf32>
    %c0_7 = arith.constant 0 : index
    %c0_8 = arith.constant 0 : index
    %8 = vector.load %arg3[%c0_7, %c0_8] : memref<16x1xf32, #tpu.memory_space<vmem>>, vector<16x1xf32>
    %9 = vector.broadcast %8 : vector<16x1xf32> to vector<16x512xf32>
    %10 = arith.addf %7, %9 : vector<16x512xf32>
    %cst_9 = arith.constant 0.000000e+00 : f32
    %11 = vector.broadcast %cst_9 : f32 to vector<16x512xf32>
    %12 = arith.maximumf %10, %11 : vector<16x512xf32>
    %c0_10 = arith.constant 0 : index
    %c0_11 = arith.constant 0 : index
    %13 = vector.load %arg4[%c0_10, %c0_11] : memref<16x1xf32, #tpu.memory_space<vmem>>, vector<16x1xf32>
    %14 = vector.broadcast %13 : vector<16x1xf32> to vector<16x512xf32>
    %15 = arith.mulf %12, %14 : vector<16x512xf32>
    %c0_12 = arith.constant 0 : index
    %c0_13 = arith.constant 0 : index
    %16 = vector.load %arg5[%c0_12, %c0_13] : memref<16x1xf32, #tpu.memory_space<vmem>>, vector<16x1xf32>
    %17 = vector.broadcast %16 : vector<16x1xf32> to vector<16x512xf32>
    %18 = arith.addf %15, %17 : vector<16x512xf32>
    %c0_14 = arith.constant 0 : index
    %c0_15 = arith.constant 0 : index
    %19 = vector.load %arg6[%c0_14, %c0_15] : memref<16x512xf32, #tpu.memory_space<vmem>>, vector<16x512xf32>
    tpu.vector_store %arg6[%c0_14, %c0_15], %18 {strides = array<i32>} : memref<16x512xf32, #tpu.memory_space<vmem>>, vector<16x512xf32>,
    return
  }
  func.func @transform_0(%arg0: i32) -> (i32, i32, i32) {
    %c0_i32 = arith.constant 0 : i32
    %c0_i32_0 = arith.constant 0 : i32
    %c0_i32_1 = arith.constant 0 : i32
    return %c0_i32, %c0_i32_0, %arg0 : i32, i32, i32
  }
  func.func @transform_1(%arg0: i32) -> (i32, i32) {
    %c0_i32 = arith.constant 0 : i32
    %c0_i32_0 = arith.constant 0 : i32
    %c0_i32_1 = arith.constant 0 : i32
    return %c0_i32, %c0_i32_0 : i32, i32
  }
  func.func @transform_2(%arg0: i32) -> (i32, i32) {
    %c0_i32 = arith.constant 0 : i32
    %c0_i32_0 = arith.constant 0 : i32
    %c0_i32_1 = arith.constant 0 : i32
    return %c0_i32, %c0_i32_0 : i32, i32
  }
  func.func @transform_3(%arg0: i32) -> (i32, i32) {
    %c0_i32 = arith.constant 0 : i32
    %c0_i32_0 = arith.constant 0 : i32
    %c0_i32_1 = arith.constant 0 : i32
    return %c0_i32, %c0_i32_0 : i32, i32
  }
  func.func @transform_4(%arg0: i32) -> (i32, i32) {
    %c0_i32 = arith.constant 0 : i32
    %c0_i32_0 = arith.constant 0 : i32
    %c0_i32_1 = arith.constant 0 : i32
    return %c0_i32, %c0_i32_0 : i32, i32
  }
  func.func @transform_5(%arg0: i32) -> (i32, i32) {
    %c0_i32 = arith.constant 0 : i32
    %c0_i32_0 = arith.constant 0 : i32
    return %c0_i32, %arg0 : i32, i32
  }
}

module attributes {stable_mosaic.version = 11 : i64} {
  func.func @_stage_kernel(%arg0: i32, %arg1: memref<2x32x256xbf16, #tpu.memory_space<vmem>>, %arg2: memref<16x32xbf16, #tpu.memory_space<vmem>>, %arg3: memref<16x1xf32, #tpu.memory_space<vmem>>, %arg4: memref<16x1xf32, #tpu.memory_space<vmem>>, %arg5: memref<16x1xf32, #tpu.memory_space<vmem>>, %arg6: memref<16x256xf32, #tpu.memory_space<vmem>>) attributes {dimension_semantics = [#tpu.dimension_semantics<parallel>], iteration_bounds = array<i64: 7>, scalar_prefetch = 0 : i64, scratch_operands = 0 : i64, tpu.core_type = #tpu.core_type<tc>, window_params = [{transform_indices = @transform_0, window_bounds = array<i64: 2, 32, 256>}, {pipeline_mode = #tpu.pipeline_mode<synchronous>, transform_indices = @transform_1, window_bounds = array<i64: 16, 32>}, {pipeline_mode = #tpu.pipeline_mode<synchronous>, transform_indices = @transform_2, window_bounds = array<i64: 16, 1>}, {pipeline_mode = #tpu.pipeline_mode<synchronous>, transform_indices = @transform_3, window_bounds = array<i64: 16, 1>}, {pipeline_mode = #tpu.pipeline_mode<synchronous>, transform_indices = @transform_4, window_bounds = array<i64: 16, 1>}, {transform_indices = @transform_5, window_bounds = array<i64: 16, 256>}]} {
    %c0 = arith.constant 0 : index
    %c0_0 = arith.constant 0 : index
    %0 = vector.load %arg2[%c0, %c0_0] : memref<16x32xbf16, #tpu.memory_space<vmem>>, vector<16x32xbf16>
    %c0_1 = arith.constant 0 : index
    %c0_2 = arith.constant 0 : index
    %c0_3 = arith.constant 0 : index
    %1 = vector.load %arg1[%c0_1, %c0_2, %c0_3] : memref<2x32x256xbf16, #tpu.memory_space<vmem>>, vector<1x32x256xbf16>
    %2 = vector.shape_cast %1 : vector<1x32x256xbf16> to vector<32x256xbf16>
    %cst = arith.constant dense<0.000000e+00> : vector<16x256xf32>
    %3 = tpu.matmul %0, %2, %cst {dimension_numbers = #tpu.dot_dimension_numbers<[1], [0], [0], [1], [0, 0, 1, 1], [], []>} : vector<16x32xbf16>, vector<32x256xbf16>, vector<16x256xf32> -> vector<16x256xf32>
    %c1 = arith.constant 1 : index
    %c0_4 = arith.constant 0 : index
    %c0_5 = arith.constant 0 : index
    %4 = vector.load %arg1[%c1, %c0_4, %c0_5] : memref<2x32x256xbf16, #tpu.memory_space<vmem>>, vector<1x32x256xbf16>
    %5 = vector.shape_cast %4 : vector<1x32x256xbf16> to vector<32x256xbf16>
    %cst_6 = arith.constant dense<0.000000e+00> : vector<16x256xf32>
    %6 = tpu.matmul %0, %5, %cst_6 {dimension_numbers = #tpu.dot_dimension_numbers<[1], [0], [0], [1], [0, 0, 1, 1], [], []>} : vector<16x32xbf16>, vector<32x256xbf16>, vector<16x256xf32> -> vector<16x256xf32>
    %7 = arith.maximumf %3, %6 : vector<16x256xf32>
    %c0_7 = arith.constant 0 : index
    %c0_8 = arith.constant 0 : index
    %8 = vector.load %arg3[%c0_7, %c0_8] : memref<16x1xf32, #tpu.memory_space<vmem>>, vector<16x1xf32>
    %9 = vector.broadcast %8 : vector<16x1xf32> to vector<16x256xf32>
    %10 = arith.addf %7, %9 : vector<16x256xf32>
    %cst_9 = arith.constant 0.000000e+00 : f32
    %11 = vector.broadcast %cst_9 : f32 to vector<16x256xf32>
    %12 = arith.maximumf %10, %11 : vector<16x256xf32>
    %c0_10 = arith.constant 0 : index
    %c0_11 = arith.constant 0 : index
    %13 = vector.load %arg4[%c0_10, %c0_11] : memref<16x1xf32, #tpu.memory_space<vmem>>, vector<16x1xf32>
    %14 = vector.broadcast %13 : vector<16x1xf32> to vector<16x256xf32>
    %15 = arith.mulf %12, %14 : vector<16x256xf32>
    %c0_12 = arith.constant 0 : index
    %c0_13 = arith.constant 0 : index
    %16 = vector.load %arg5[%c0_12, %c0_13] : memref<16x1xf32, #tpu.memory_space<vmem>>, vector<16x1xf32>
    %17 = vector.broadcast %16 : vector<16x1xf32> to vector<16x256xf32>
    %18 = arith.addf %15, %17 : vector<16x256xf32>
    %c0_14 = arith.constant 0 : index
    %c0_15 = arith.constant 0 : index
    %19 = vector.load %arg6[%c0_14, %c0_15] : memref<16x256xf32, #tpu.memory_space<vmem>>, vector<16x256xf32>
    tpu.vector_store %arg6[%c0_14, %c0_15], %18 {strides = array<i32>} : memref<16x256xf32, #tpu.memory_space<vmem>>, vector<16x256xf32>,
    return
  }
  func.func @transform_0(%arg0: i32) -> (i32, i32, i32) {
    %c0_i32 = arith.constant 0 : i32
    %c0_i32_0 = arith.constant 0 : i32
    %c0_i32_1 = arith.constant 0 : i32
    return %c0_i32, %c0_i32_0, %arg0 : i32, i32, i32
  }
  func.func @transform_1(%arg0: i32) -> (i32, i32) {
    %c0_i32 = arith.constant 0 : i32
    %c0_i32_0 = arith.constant 0 : i32
    %c0_i32_1 = arith.constant 0 : i32
    return %c0_i32, %c0_i32_0 : i32, i32
  }
  func.func @transform_2(%arg0: i32) -> (i32, i32) {
    %c0_i32 = arith.constant 0 : i32
    %c0_i32_0 = arith.constant 0 : i32
    %c0_i32_1 = arith.constant 0 : i32
    return %c0_i32, %c0_i32_0 : i32, i32
  }
  func.func @transform_3(%arg0: i32) -> (i32, i32) {
    %c0_i32 = arith.constant 0 : i32
    %c0_i32_0 = arith.constant 0 : i32
    %c0_i32_1 = arith.constant 0 : i32
    return %c0_i32, %c0_i32_0 : i32, i32
  }
  func.func @transform_4(%arg0: i32) -> (i32, i32) {
    %c0_i32 = arith.constant 0 : i32
    %c0_i32_0 = arith.constant 0 : i32
    %c0_i32_1 = arith.constant 0 : i32
    return %c0_i32, %c0_i32_0 : i32, i32
  }
  func.func @transform_5(%arg0: i32) -> (i32, i32) {
    %c0_i32 = arith.constant 0 : i32
    %c0_i32_0 = arith.constant 0 : i32
    return %c0_i32, %arg0 : i32, i32
  }
}

module attributes {stable_mosaic.version = 11 : i64} {
  func.func @_stage_kernel(%arg0: i32, %arg1: memref<4x64x256xbf16, #tpu.memory_space<vmem>>, %arg2: memref<32x64xbf16, #tpu.memory_space<vmem>>, %arg3: memref<32x1xf32, #tpu.memory_space<vmem>>, %arg4: memref<32x1xf32, #tpu.memory_space<vmem>>, %arg5: memref<32x1xf32, #tpu.memory_space<vmem>>, %arg6: memref<32x256xf32, #tpu.memory_space<vmem>>) attributes {dimension_semantics = [#tpu.dimension_semantics<parallel>], iteration_bounds = array<i64: 2>, scalar_prefetch = 0 : i64, scratch_operands = 0 : i64, tpu.core_type = #tpu.core_type<tc>, window_params = [{transform_indices = @transform_0, window_bounds = array<i64: 4, 64, 256>}, {pipeline_mode = #tpu.pipeline_mode<synchronous>, transform_indices = @transform_1, window_bounds = array<i64: 32, 64>}, {pipeline_mode = #tpu.pipeline_mode<synchronous>, transform_indices = @transform_2, window_bounds = array<i64: 32, 1>}, {pipeline_mode = #tpu.pipeline_mode<synchronous>, transform_indices = @transform_3, window_bounds = array<i64: 32, 1>}, {pipeline_mode = #tpu.pipeline_mode<synchronous>, transform_indices = @transform_4, window_bounds = array<i64: 32, 1>}, {transform_indices = @transform_5, window_bounds = array<i64: 32, 256>}]} {
    %c0 = arith.constant 0 : index
    %c0_0 = arith.constant 0 : index
    %0 = vector.load %arg2[%c0, %c0_0] : memref<32x64xbf16, #tpu.memory_space<vmem>>, vector<32x64xbf16>
    %c0_1 = arith.constant 0 : index
    %c0_2 = arith.constant 0 : index
    %c0_3 = arith.constant 0 : index
    %1 = vector.load %arg1[%c0_1, %c0_2, %c0_3] : memref<4x64x256xbf16, #tpu.memory_space<vmem>>, vector<1x64x256xbf16>
    %2 = vector.shape_cast %1 : vector<1x64x256xbf16> to vector<64x256xbf16>
    %cst = arith.constant dense<0.000000e+00> : vector<32x256xf32>
    %3 = tpu.matmul %0, %2, %cst {dimension_numbers = #tpu.dot_dimension_numbers<[1], [0], [0], [1], [0, 0, 1, 1], [], []>} : vector<32x64xbf16>, vector<64x256xbf16>, vector<32x256xf32> -> vector<32x256xf32>
    %c1 = arith.constant 1 : index
    %c0_4 = arith.constant 0 : index
    %c0_5 = arith.constant 0 : index
    %4 = vector.load %arg1[%c1, %c0_4, %c0_5] : memref<4x64x256xbf16, #tpu.memory_space<vmem>>, vector<1x64x256xbf16>
    %5 = vector.shape_cast %4 : vector<1x64x256xbf16> to vector<64x256xbf16>
    %cst_6 = arith.constant dense<0.000000e+00> : vector<32x256xf32>
    %6 = tpu.matmul %0, %5, %cst_6 {dimension_numbers = #tpu.dot_dimension_numbers<[1], [0], [0], [1], [0, 0, 1, 1], [], []>} : vector<32x64xbf16>, vector<64x256xbf16>, vector<32x256xf32> -> vector<32x256xf32>
    %7 = arith.maximumf %3, %6 : vector<32x256xf32>
    %c2 = arith.constant 2 : index
    %c0_7 = arith.constant 0 : index
    %c0_8 = arith.constant 0 : index
    %8 = vector.load %arg1[%c2, %c0_7, %c0_8] : memref<4x64x256xbf16, #tpu.memory_space<vmem>>, vector<1x64x256xbf16>
    %9 = vector.shape_cast %8 : vector<1x64x256xbf16> to vector<64x256xbf16>
    %cst_9 = arith.constant dense<0.000000e+00> : vector<32x256xf32>
    %10 = tpu.matmul %0, %9, %cst_9 {dimension_numbers = #tpu.dot_dimension_numbers<[1], [0], [0], [1], [0, 0, 1, 1], [], []>} : vector<32x64xbf16>, vector<64x256xbf16>, vector<32x256xf32> -> vector<32x256xf32>
    %11 = arith.maximumf %7, %10 : vector<32x256xf32>
    %c3 = arith.constant 3 : index
    %c0_10 = arith.constant 0 : index
    %c0_11 = arith.constant 0 : index
    %12 = vector.load %arg1[%c3, %c0_10, %c0_11] : memref<4x64x256xbf16, #tpu.memory_space<vmem>>, vector<1x64x256xbf16>
    %13 = vector.shape_cast %12 : vector<1x64x256xbf16> to vector<64x256xbf16>
    %cst_12 = arith.constant dense<0.000000e+00> : vector<32x256xf32>
    %14 = tpu.matmul %0, %13, %cst_12 {dimension_numbers = #tpu.dot_dimension_numbers<[1], [0], [0], [1], [0, 0, 1, 1], [], []>} : vector<32x64xbf16>, vector<64x256xbf16>, vector<32x256xf32> -> vector<32x256xf32>
    %15 = arith.maximumf %11, %14 : vector<32x256xf32>
    %c0_13 = arith.constant 0 : index
    %c0_14 = arith.constant 0 : index
    %16 = vector.load %arg3[%c0_13, %c0_14] : memref<32x1xf32, #tpu.memory_space<vmem>>, vector<32x1xf32>
    %17 = vector.broadcast %16 : vector<32x1xf32> to vector<32x256xf32>
    %18 = arith.addf %15, %17 : vector<32x256xf32>
    %cst_15 = arith.constant 0.000000e+00 : f32
    %19 = vector.broadcast %cst_15 : f32 to vector<32x256xf32>
    %20 = arith.maximumf %18, %19 : vector<32x256xf32>
    %c0_16 = arith.constant 0 : index
    %c0_17 = arith.constant 0 : index
    %21 = vector.load %arg4[%c0_16, %c0_17] : memref<32x1xf32, #tpu.memory_space<vmem>>, vector<32x1xf32>
    %22 = vector.broadcast %21 : vector<32x1xf32> to vector<32x256xf32>
    %23 = arith.mulf %20, %22 : vector<32x256xf32>
    %c0_18 = arith.constant 0 : index
    %c0_19 = arith.constant 0 : index
    %24 = vector.load %arg5[%c0_18, %c0_19] : memref<32x1xf32, #tpu.memory_space<vmem>>, vector<32x1xf32>
    %25 = vector.broadcast %24 : vector<32x1xf32> to vector<32x256xf32>
    %26 = arith.addf %23, %25 : vector<32x256xf32>
    %c0_20 = arith.constant 0 : index
    %c0_21 = arith.constant 0 : index
    %27 = vector.load %arg6[%c0_20, %c0_21] : memref<32x256xf32, #tpu.memory_space<vmem>>, vector<32x256xf32>
    tpu.vector_store %arg6[%c0_20, %c0_21], %26 {strides = array<i32>} : memref<32x256xf32, #tpu.memory_space<vmem>>, vector<32x256xf32>,
    return
  }
  func.func @transform_0(%arg0: i32) -> (i32, i32, i32) {
    %c0_i32 = arith.constant 0 : i32
    %c0_i32_0 = arith.constant 0 : i32
    %c0_i32_1 = arith.constant 0 : i32
    return %c0_i32, %c0_i32_0, %arg0 : i32, i32, i32
  }
  func.func @transform_1(%arg0: i32) -> (i32, i32) {
    %c0_i32 = arith.constant 0 : i32
    %c0_i32_0 = arith.constant 0 : i32
    %c0_i32_1 = arith.constant 0 : i32
    return %c0_i32, %c0_i32_0 : i32, i32
  }
  func.func @transform_2(%arg0: i32) -> (i32, i32) {
    %c0_i32 = arith.constant 0 : i32
    %c0_i32_0 = arith.constant 0 : i32
    %c0_i32_1 = arith.constant 0 : i32
    return %c0_i32, %c0_i32_0 : i32, i32
  }
  func.func @transform_3(%arg0: i32) -> (i32, i32) {
    %c0_i32 = arith.constant 0 : i32
    %c0_i32_0 = arith.constant 0 : i32
    %c0_i32_1 = arith.constant 0 : i32
    return %c0_i32, %c0_i32_0 : i32, i32
  }
  func.func @transform_4(%arg0: i32) -> (i32, i32) {
    %c0_i32 = arith.constant 0 : i32
    %c0_i32_0 = arith.constant 0 : i32
    %c0_i32_1 = arith.constant 0 : i32
    return %c0_i32, %c0_i32_0 : i32, i32
  }
  func.func @transform_5(%arg0: i32) -> (i32, i32) {
    %c0_i32 = arith.constant 0 : i32
    %c0_i32_0 = arith.constant 0 : i32
    return %c0_i32, %arg0 : i32, i32
  }
}

module attributes {stable_mosaic.version = 11 : i64} {
  func.func @_stage_kernel(%arg0: i32, %arg1: memref<4x128x84xbf16, #tpu.memory_space<vmem>>, %arg2: memref<32x128xbf16, #tpu.memory_space<vmem>>, %arg3: memref<32x1xf32, #tpu.memory_space<vmem>>, %arg4: memref<32x1xf32, #tpu.memory_space<vmem>>, %arg5: memref<32x1xf32, #tpu.memory_space<vmem>>, %arg6: memref<32x84xf32, #tpu.memory_space<vmem>>) attributes {dimension_semantics = [#tpu.dimension_semantics<parallel>], iteration_bounds = array<i64: 1>, scalar_prefetch = 0 : i64, scratch_operands = 0 : i64, tpu.core_type = #tpu.core_type<tc>, window_params = [{transform_indices = @transform_0, window_bounds = array<i64: 4, 128, 84>}, {pipeline_mode = #tpu.pipeline_mode<synchronous>, transform_indices = @transform_1, window_bounds = array<i64: 32, 128>}, {pipeline_mode = #tpu.pipeline_mode<synchronous>, transform_indices = @transform_2, window_bounds = array<i64: 32, 1>}, {pipeline_mode = #tpu.pipeline_mode<synchronous>, transform_indices = @transform_3, window_bounds = array<i64: 32, 1>}, {pipeline_mode = #tpu.pipeline_mode<synchronous>, transform_indices = @transform_4, window_bounds = array<i64: 32, 1>}, {transform_indices = @transform_5, window_bounds = array<i64: 32, 84>}]} {
    %c0 = arith.constant 0 : index
    %c0_0 = arith.constant 0 : index
    %0 = vector.load %arg2[%c0, %c0_0] : memref<32x128xbf16, #tpu.memory_space<vmem>>, vector<32x128xbf16>
    %c0_1 = arith.constant 0 : index
    %c0_2 = arith.constant 0 : index
    %c0_3 = arith.constant 0 : index
    %1 = vector.load %arg1[%c0_1, %c0_2, %c0_3] : memref<4x128x84xbf16, #tpu.memory_space<vmem>>, vector<1x128x84xbf16>
    %2 = vector.shape_cast %1 : vector<1x128x84xbf16> to vector<128x84xbf16>
    %cst = arith.constant dense<0.000000e+00> : vector<32x84xf32>
    %3 = tpu.matmul %0, %2, %cst {dimension_numbers = #tpu.dot_dimension_numbers<[1], [0], [0], [1], [0, 0, 1, 1], [], []>} : vector<32x128xbf16>, vector<128x84xbf16>, vector<32x84xf32> -> vector<32x84xf32>
    %c1 = arith.constant 1 : index
    %c0_4 = arith.constant 0 : index
    %c0_5 = arith.constant 0 : index
    %4 = vector.load %arg1[%c1, %c0_4, %c0_5] : memref<4x128x84xbf16, #tpu.memory_space<vmem>>, vector<1x128x84xbf16>
    %5 = vector.shape_cast %4 : vector<1x128x84xbf16> to vector<128x84xbf16>
    %cst_6 = arith.constant dense<0.000000e+00> : vector<32x84xf32>
    %6 = tpu.matmul %0, %5, %cst_6 {dimension_numbers = #tpu.dot_dimension_numbers<[1], [0], [0], [1], [0, 0, 1, 1], [], []>} : vector<32x128xbf16>, vector<128x84xbf16>, vector<32x84xf32> -> vector<32x84xf32>
    %7 = arith.maximumf %3, %6 : vector<32x84xf32>
    %c2 = arith.constant 2 : index
    %c0_7 = arith.constant 0 : index
    %c0_8 = arith.constant 0 : index
    %8 = vector.load %arg1[%c2, %c0_7, %c0_8] : memref<4x128x84xbf16, #tpu.memory_space<vmem>>, vector<1x128x84xbf16>
    %9 = vector.shape_cast %8 : vector<1x128x84xbf16> to vector<128x84xbf16>
    %cst_9 = arith.constant dense<0.000000e+00> : vector<32x84xf32>
    %10 = tpu.matmul %0, %9, %cst_9 {dimension_numbers = #tpu.dot_dimension_numbers<[1], [0], [0], [1], [0, 0, 1, 1], [], []>} : vector<32x128xbf16>, vector<128x84xbf16>, vector<32x84xf32> -> vector<32x84xf32>
    %11 = arith.maximumf %7, %10 : vector<32x84xf32>
    %c3 = arith.constant 3 : index
    %c0_10 = arith.constant 0 : index
    %c0_11 = arith.constant 0 : index
    %12 = vector.load %arg1[%c3, %c0_10, %c0_11] : memref<4x128x84xbf16, #tpu.memory_space<vmem>>, vector<1x128x84xbf16>
    %13 = vector.shape_cast %12 : vector<1x128x84xbf16> to vector<128x84xbf16>
    %cst_12 = arith.constant dense<0.000000e+00> : vector<32x84xf32>
    %14 = tpu.matmul %0, %13, %cst_12 {dimension_numbers = #tpu.dot_dimension_numbers<[1], [0], [0], [1], [0, 0, 1, 1], [], []>} : vector<32x128xbf16>, vector<128x84xbf16>, vector<32x84xf32> -> vector<32x84xf32>
    %15 = arith.maximumf %11, %14 : vector<32x84xf32>
    %c0_13 = arith.constant 0 : index
    %c0_14 = arith.constant 0 : index
    %16 = vector.load %arg3[%c0_13, %c0_14] : memref<32x1xf32, #tpu.memory_space<vmem>>, vector<32x1xf32>
    %17 = vector.broadcast %16 : vector<32x1xf32> to vector<32x84xf32>
    %18 = arith.addf %15, %17 : vector<32x84xf32>
    %cst_15 = arith.constant 0.000000e+00 : f32
    %19 = vector.broadcast %cst_15 : f32 to vector<32x84xf32>
    %20 = arith.maximumf %18, %19 : vector<32x84xf32>
    %c0_16 = arith.constant 0 : index
    %c0_17 = arith.constant 0 : index
    %21 = vector.load %arg4[%c0_16, %c0_17] : memref<32x1xf32, #tpu.memory_space<vmem>>, vector<32x1xf32>
    %22 = vector.broadcast %21 : vector<32x1xf32> to vector<32x84xf32>
    %23 = arith.mulf %20, %22 : vector<32x84xf32>
    %c0_18 = arith.constant 0 : index
    %c0_19 = arith.constant 0 : index
    %24 = vector.load %arg5[%c0_18, %c0_19] : memref<32x1xf32, #tpu.memory_space<vmem>>, vector<32x1xf32>
    %25 = vector.broadcast %24 : vector<32x1xf32> to vector<32x84xf32>
    %26 = arith.addf %23, %25 : vector<32x84xf32>
    %c0_20 = arith.constant 0 : index
    %c0_21 = arith.constant 0 : index
    %27 = vector.load %arg6[%c0_20, %c0_21] : memref<32x84xf32, #tpu.memory_space<vmem>>, vector<32x84xf32>
    tpu.vector_store %arg6[%c0_20, %c0_21], %26 {strides = array<i32>} : memref<32x84xf32, #tpu.memory_space<vmem>>, vector<32x84xf32>,
    return
  }
  func.func @transform_0(%arg0: i32) -> (i32, i32, i32) {
    %c0_i32 = arith.constant 0 : i32
    %c0_i32_0 = arith.constant 0 : i32
    %c0_i32_1 = arith.constant 0 : i32
    return %c0_i32, %c0_i32_0, %arg0 : i32, i32, i32
  }
  func.func @transform_1(%arg0: i32) -> (i32, i32) {
    %c0_i32 = arith.constant 0 : i32
    %c0_i32_0 = arith.constant 0 : i32
    %c0_i32_1 = arith.constant 0 : i32
    return %c0_i32, %c0_i32_0 : i32, i32
  }
  func.func @transform_2(%arg0: i32) -> (i32, i32) {
    %c0_i32 = arith.constant 0 : i32
    %c0_i32_0 = arith.constant 0 : i32
    %c0_i32_1 = arith.constant 0 : i32
    return %c0_i32, %c0_i32_0 : i32, i32
  }
  func.func @transform_3(%arg0: i32) -> (i32, i32) {
    %c0_i32 = arith.constant 0 : i32
    %c0_i32_0 = arith.constant 0 : i32
    %c0_i32_1 = arith.constant 0 : i32
    return %c0_i32, %c0_i32_0 : i32, i32
  }
  func.func @transform_4(%arg0: i32) -> (i32, i32) {
    %c0_i32 = arith.constant 0 : i32
    %c0_i32_0 = arith.constant 0 : i32
    %c0_i32_1 = arith.constant 0 : i32
    return %c0_i32, %c0_i32_0 : i32, i32
  }
  func.func @transform_5(%arg0: i32) -> (i32, i32) {
    %c0_i32 = arith.constant 0 : i32
    %c0_i32_0 = arith.constant 0 : i32
    return %c0_i32, %arg0 : i32, i32
  }
}

</mosaic_0001>

<bundles_post_ra>
// kernel: cnn_forward.6
= control target key start
LH: loop header
LB: loop body
LE: loop exit
PB: predicated region body
PF: predicated region fallthrough
CT: control target
= control target key end

     0   :  { %s733_s18 = smov 0   ;;  %s735_s19 = smov 0   ;;  %s809_s0 = inlined_call_operand.vmem [shape: bf16[2,2,14336], index: 0, kind: input, shape index: {}]   ;;  %s810_s1 = inlined_call_operand.vmem [shape: bf16[8,2], index: 1, kind: input, shape index: {}]   ;;  %s811_s2 = inlined_call_operand.vmem [shape: f32[8,1], index: 2, kind: input, shape index: {}]   ;;  %s812_s3 = inlined_call_operand.vmem [shape: f32[8,1], index: 3, kind: input, shape index: {}]   ;;  %s813_s4 = inlined_call_operand.vmem [shape: f32[8,1], index: 4, kind: input, shape index: {}]   ;;  %s814_s5 = inlined_call_operand.vmem [shape: f32[8,14336], index: 5, kind: output, shape index: {}]  }
   0x1   :  { %s737_s20 = smov 0  }
   0x2 LB: > { %s626_s21 = sadd.s32 4294967295, %s699_s20   ;;  %s750_s22 = sadd.s32 1, %s699_s20   ;;  %s699_s20 = sphi %s737_s20, %s817_s20   ;;  %s695_s19 = sphi %s735_s19, %s816_s19   ;;  %s691_s18 = sphi %s733_s18, %s815_s18  }
   0x3   : > { %s19_s23 = ssub.s32 %s699_s20, %s750_s22  ;;  %s22_s24 = sadd.s32 1, %s695_s19 }
   0x4   : > { %p20_p0 = scmp.eq.s32.totalorder %s19_s23, 0  ;;  %p29_p1 = scmp.ne.s32.totalorder %s695_s19, %s691_s18 }
   0x5   : > { %p30_p2 = scmp.eq.s32.totalorder %s699_s20, 0  ;;  %p629_p4 = scmp.ge.s32.totalorder %s699_s20, 28 }
   0x6   : > { %s759_s25 = scalar_select %p20_p0, %s695_s19, %s22_s24  }
   0x7   : > { %p31_p3 = por %p30_p2, %p29_p1  ;;  %177 = sbr.rel (%p629_p4) target bundleno = 17 (0x11), region = 32 }
   0xc   : > { %180 = sbr.rel (!%p31_p3) target bundleno = 17 (0x11), region = 36  ;;  %s182_s26 = sand.u32 (%p31_p3), 1, %s695_s19  }
   0xd   : > { %s631_s27 = sshll.u32 (%p31_p3), %s699_s20, 2  ;;  %s630_s28 = sshll.u32 (%p31_p3), %s182_s26, 3 }
   0xe   : > { %s186_s6 = scalar_lea.vmem (%p31_p3), %s809_s0, %s631_s27  ;;  %s184_s7 = scalar_lea.vmem (%p31_p3), [#allocation2], %s630_s28 }
   0xf   : > { %v203_v0 = vld [vmem:[%s186_s6] sm:$0xf] (%p31_p3)  ;;  %v205_v1 = vld [vmem:[%s186_s6 + $0x70] sm:$0xf] (%p31_p3) }
  0x10   : > { %204 = vst [vmem:[%s184_s7] sm:$0xf] (%p31_p3), %v203_v0  ;;  %206 = vst [vmem:[%s184_s7 + $0x4] sm:$0xf] (%p31_p3), %v205_v1 }
  0x11 PF: > { %p632_p5 = scmp.ge.s32.totalorder %s699_s20, 1  ;;  %p233_p6 = scmp.lt.s32.totalorder %s699_s20, 29 }
  0x13   : > { %p234_p7 = pnand %p632_p5, %p233_p6 }
  0x14   : > { %s240_s8 = sand.u32 (!%p234_p7), 1, %s691_s18   ;;  %s634_s23 = sshll.u32 (!%p234_p7), %s626_s21, 2 }
  0x15   : > { %237 = sbr.rel (%p234_p7) target bundleno = 255 (0xff), region = 77  ;;  %s633_s11 = sshll.u32 (!%p234_p7), %s240_s8, 3 }
  0x16   : > { %s242_s14 = scalar_lea.vmem (!%p234_p7), [#allocation2], %s633_s11  ;;  %p269_p8 = scmp.lt.s32.totalorder (!%p234_p7), %s634_s23, 111 }
  0x1a   : > { %v289_v2 = vlaneseq  ;;  %v526_v3 = vld [vmem:[%s811_s2] sm:$0xff]  ;;  %v701_v4 = vmov 1966171168   ;;  %v702_v6 = vmov 0   ;;  %vm306_vm0 = vcmask 1040384   ;;  %s819_s23 = smov (!%p269_p8, %s634_s23), 111 }
  0x1b   : > { %v287_v5 = vunpack.c.l.s4 %v701_v4  ;;  %351 = vmatprep.mubr.bf16.mxu0 %v702_v6  ;;  %392 = vmatprep.mubr.bf16.mxu1 %v702_v6  ;;  %v550_v7 = vld [vmem:[%s813_s4] sm:$0xff]  ;;  %vm302_vm1 = vcmask 15360   ;;  %s635_s20 = sshll.u32 %s819_s23, 3 }
  0x1c   : > { %v290_v8 = vshrl.u32 %v289_v2, 7  ;;  %675 = vset.pattern.permute.xlu0 %v702_v6  ;;  %676 = vset.pattern.permute.xlu1 %v702_v6  ;;  %v636_v9 = vld.sshfl [vmem:[%s242_s14] sm:$0x33 pattern:$0x75316420]  ;;  %s272_s26 = scalar_lea.vmem %s814_s5, %s635_s20 }
  0x1d   : > { %v288_v10 = vunpack.c.0.s8 %v287_v5  ;;  %529 = vperm.xlu0 %675, %v526_v3   ;;  %553 = vperm.xlu1 %676, %v550_v7   ;;  %v285_v11 = vcombine.high %v636_v9, %v636_v9  ;;  %v642_v12 = vld.sshfl [vmem:[%s242_s14 + $0x4] sm:$0x33 pattern:$0x75316420]  ;;  %v275_v24 = vld [vmem:[%s810_s1] sm:$0xf] }
  0x1e   : > { %v540_v13 = vld [vmem:[%s812_s3] sm:$0xff]  ;;  %v411_v15 = vcombine.high %v642_v12, %v642_v12 }
  0x1f   : > { %v291_v14 = vsub.s32 %v288_v10, %v290_v8 }
  0x21   : > { %v299_v16 = vrot.slane %v285_v11, %v291_v14  ;;  %v292_v17 = vrot.slane %v636_v9, %v291_v14  ;;  %v425_v18 = vrot.slane %v411_v15, %v291_v14  ;;  %v418_v19 = vrot.slane %v642_v12, %v291_v14  ;;  %543 = vperm.xlu0 %675, %v540_v13  }
  0x23   : > { %637 = vmatprep.subr.msk.bf16.mxu0 %vm306_vm0, %v299_v16  ;;  %v308_v20 = vsel %vm306_vm0, %v292_v17, 0  ;;  %v301_v21 = vcombine.high %v299_v16, %v299_v16  ;;  %v300_v22 = vcombine.high %v292_v17, %v292_v17  ;;  %v427_v23 = vcombine.high %v425_v18, %v425_v18 }
  0x24   : > { %334 = vmatpush1.bf16.msra.mxu0 %v308_v20  ;;  %v426_v25 = vcombine.high %v418_v19, %v418_v19  ;;  %v429_v27 = vsel %vm306_vm0, %v418_v19, 0 }
  0x25   : > { %639 = vmatprep.subr.msk.bf16.mxu1 %vm306_vm0, %v301_v21  ;;  %v314_v26 = vsel %vm306_vm0, %v300_v22, 0  ;;  %643 = vmatprep.subr.msk.bf16.mxu0 %vm306_vm0, %v425_v18 }
  0x26   : > { %375 = vmatpush1.bf16.msra.mxu1 %v314_v26  ;;  %v435_v28 = vsel %vm306_vm0, %v426_v25, 0 }
  0x27   : > { %638 = vmatmul.mubr.msk.bf16.vlgmr.msra.gmra.mxu0 %vm302_vm1, %v275_v24  ;;  %645 = vmatprep.subr.msk.bf16.mxu1 %vm306_vm0, %v427_v23 }
  0x28   : > { %455 = vmatpush1.bf16.msra.mxu0 %v429_v27  ;;  %472 = vmatprep.mubr.bf16.mxu0 %v702_v6 }
  0x29   : > { %640 = vmatmul.mubr.msk.bf16.vlgmr.msra.gmra.mxu1 %vm302_vm1, %v275_v24 }
  0x2a   : > { %496 = vmatpush1.bf16.msra.mxu1 %v435_v28  ;;  %513 = vmatprep.mubr.bf16.mxu1 %v702_v6 }
  0x2f   : > { %644 = vmatmul.mubr.msk.bf16.vlgmr.msra.gmra.mxu0 %vm302_vm1, %v275_v24 }
  0x31   : > { %646 = vmatmul.mubr.msk.bf16.vlgmr.msra.gmra.mxu1 %vm302_vm1, %v275_v24 }
  0x98   : > { %v530_v34 = vpop.permute.xlu0 %529  ;;  %v554_v52 = vpop.permute.xlu1 %553 }
  0x9c   : > { %v544_v45 = vpop.permute.xlu0 %543 }
  0xe7   : > { %v353_v29 = vpop.f32.mrf.mxu0 }
  0xe9   : > { %v355_v30 = vpop.f32.mrf.mxu0  ;;  %v394_v31 = vpop.f32.mrf.mxu1 }
  0xeb   : > { %v357_v32 = vpop.f32.mrf.mxu0  ;;  %v396_v33 = vpop.f32.mrf.mxu1 }
  0xed   : > { %v358_v35 = vpop.f32.mrf.mxu0  ;;  %v398_v36 = vpop.f32.mrf.mxu1 }
  0xef   : > { %v399_v37 = vpop.f32.mrf.mxu1  ;;  %v474_v38 = vpop.f32.mrf.mxu0 }
  0xf0   : > { %v522_v39 = vmax.f32 %v353_v29, %v474_v38 }
  0xf1   : > { %v476_v40 = vpop.f32.mrf.mxu0  ;;  %v515_v41 = vpop.f32.mrf.mxu1 }
  0xf2   : > { %v532_v42 = vadd.f32 %v530_v34, %v522_v39  ;;  %v523_v43 = vmax.f32 %v355_v30, %v476_v40  ;;  %v524_v44 = vmax.f32 %v394_v31, %v515_v41 }
  0xf3   : > { %v478_v46 = vpop.f32.mrf.mxu0  ;;  %v517_v47 = vpop.f32.mrf.mxu1 }
  0xf4   : > { %v533_v48 = vadd.f32 %v530_v34, %v523_v43  ;;  %v534_v49 = vadd.f32 %v530_v34, %v524_v44  ;;  %v525_v50 = vmax.f32 %v396_v33, %v517_v47  ;;  %v536_v51 = vmax.f32 %v532_v42, 0.0 }
  0xf5   : > { %v479_v53 = vpop.f32.mrf.mxu0  ;;  %v519_v54 = vpop.f32.mrf.mxu1 }
  0xf6   : > { %v537_v55 = vmax.f32 %v533_v48, 0.0  ;;  %v538_v56 = vmax.f32 %v534_v49, 0.0  ;;  %v535_v57 = vadd.f32 %v530_v34, %v525_v50  ;;  %v546_v58 = vmul.f32 %v544_v45, %v536_v51 }
  0xf7   : > { %v520_v59 = vpop.f32.mrf.mxu1 }
  0xf8   : > { %v539_v60 = vmax.f32 %v535_v57, 0.0  ;;  %v547_v61 = vmul.f32 %v544_v45, %v537_v55  ;;  %v548_v62 = vmul.f32 %v544_v45, %v538_v56  ;;  %v556_v63 = vadd.f32 %v554_v52, %v546_v58 }
  0xfa   : > { %v549_v0 = vmul.f32 %v544_v45, %v539_v60  ;;  %v557_v1 = vadd.f32 %v554_v52, %v547_v61  ;;  %v558_v2 = vadd.f32 %v554_v52, %v548_v62  ;;  %560 = vst [vmem:[%s272_s26] sm:$0xff] %v556_v63 }
  0xfc   : > { %v559_v3 = vadd.f32 %v554_v52, %v549_v0  ;;  %561 = vst [vmem:[%s272_s26 + $0x8] sm:$0xff] %v557_v1  ;;  %562 = vst [vmem:[%s272_s26 + $0x10] sm:$0xff] %v558_v2 }
  0xfe   : > { %563 = vst [vmem:[%s272_s26 + $0x18] sm:$0xff] %v559_v3 }
  0xff PF: > { %p12_p9 = scmp.ge.s32.totalorder %s750_s22, 30   ;;  %s815_s18 = smov %s695_s19 }
 0x100   : > { %s816_s19 = smov %s759_s25  ;;  %s817_s20 = smov %s750_s22 }
 0x101   :  { %14 = sbr.rel (!%p12_p9) target bundleno = 2 (0x2), region = 117 }

// kernel: cnn_forward.7
= control target key start
LH: loop header
LB: loop body
LE: loop exit
PB: predicated region body
PF: predicated region fallthrough
CT: control target
= control target key end

     0   :  { %s708_s18 = smov 0   ;;  %s710_s19 = smov 0   ;;  %s772_s0 = inlined_call_operand.vmem [shape: bf16[2,16,7168], index: 0, kind: input, shape index: {}]   ;;  %s773_s1 = inlined_call_operand.vmem [shape: bf16[8,16], index: 1, kind: input, shape index: {}]   ;;  %s774_s2 = inlined_call_operand.vmem [shape: f32[8,1], index: 2, kind: input, shape index: {}]   ;;  %s775_s3 = inlined_call_operand.vmem [shape: f32[8,1], index: 3, kind: input, shape index: {}]   ;;  %s776_s4 = inlined_call_operand.vmem [shape: f32[8,1], index: 4, kind: input, shape index: {}]   ;;  %s777_s5 = inlined_call_operand.vmem [shape: f32[8,7168], index: 5, kind: output, shape index: {}]  }
   0x1   :  { %s712_s20 = smov 0  }
   0x2 LB: > { %s584_s21 = sadd.s32 4294967295, %s675_s20   ;;  %s725_s22 = sadd.s32 1, %s675_s20   ;;  %s675_s20 = sphi %s712_s20, %s780_s20   ;;  %s671_s19 = sphi %s710_s19, %s779_s19   ;;  %s667_s18 = sphi %s708_s18, %s778_s18  }
   0x3   : > { %s19_s23 = ssub.s32 %s675_s20, %s725_s22  ;;  %s22_s24 = sadd.s32 1, %s671_s19 }
   0x4   : > { %p20_p0 = scmp.eq.s32.totalorder %s19_s23, 0  ;;  %p29_p1 = scmp.ne.s32.totalorder %s671_s19, %s667_s18 }
   0x5   : > { %p30_p2 = scmp.eq.s32.totalorder %s675_s20, 0  ;;  %p587_p4 = scmp.ge.s32.totalorder %s675_s20, 14 }
   0x6   : > { %s734_s25 = scalar_select %p20_p0, %s671_s19, %s22_s24  }
   0x7   : > { %p31_p3 = por %p30_p2, %p29_p1  ;;  %177 = sbr.rel (%p587_p4) target bundleno = 20 (0x14), region = 32 }
   0xc   : > { %180 = sbr.rel (!%p31_p3) target bundleno = 20 (0x14), region = 36  ;;  %s182_s26 = sand.u32 (%p31_p3), 1, %s671_s19  }
   0xd   : > { %s613_s27 = sshll.u32 (%p31_p3), %s675_s20, 4  ;;  %s588_s28 = sshll.u32 (%p31_p3), %s182_s26, 6 }
   0xe   : > { %s187_s6 = scalar_lea.vmem (%p31_p3), %s772_s0, %s613_s27  ;;  %s184_s7 = scalar_lea.vmem (%p31_p3), [#allocation2], %s588_s28 }
   0xf   : > { %v200_v0 = vld [vmem:[%s187_s6] sm:$0xff] (%p31_p3)  ;;  %v202_v1 = vld [vmem:[%s187_s6 + $0x8] sm:$0xff] (%p31_p3) }
  0x10   : > { %v204_v2 = vld [vmem:[%s187_s6 + $0xe0] sm:$0xff] (%p31_p3)  ;;  %201 = vst [vmem:[%s184_s7] sm:$0xff] (%p31_p3), %v200_v0  ;;  %203 = vst [vmem:[%s184_s7 + $0x8] sm:$0xff] (%p31_p3), %v202_v1  ;;  %v206_v3 = vld [vmem:[%s187_s6 + $0xe8] sm:$0xff] (%p31_p3) }
  0x11   : > { %205 = vst [vmem:[%s184_s7 + $0x10] sm:$0xff] %v204_v2  ;;  %v208_v4 = vld [vmem:[%s187_s6 + $0x1c0] sm:$0xff]  ;;  %v210_v5 = vld [vmem:[%s187_s6 + $0x1c8] sm:$0xff]  ;;  %207 = vst [vmem:[%s184_s7 + $0x18] sm:$0xff] %v206_v3 }
  0x12   : > { %209 = vst [vmem:[%s184_s7 + $0x20] sm:$0xff] %v208_v4  ;;  %211 = vst [vmem:[%s184_s7 + $0x28] sm:$0xff] %v210_v5  ;;  %v212_v6 = vld [vmem:[%s187_s6 + $0x2a0] sm:$0xff]  ;;  %v214_v7 = vld [vmem:[%s187_s6 + $0x2a8] sm:$0xff] }
  0x13   : > { %213 = vst [vmem:[%s184_s7 + $0x30] sm:$0xff] %v212_v6  ;;  %215 = vst [vmem:[%s184_s7 + $0x38] sm:$0xff] %v214_v7 }
  0x14 PF: > { %p591_p5 = scmp.ge.s32.totalorder %s675_s20, 1  ;;  %p220_p6 = scmp.lt.s32.totalorder %s675_s20, 15 }
  0x16   : > { %p221_p7 = pnand %p591_p5, %p220_p6 }
  0x17   : > { %s227_s8 = sand.u32 (!%p221_p7), 1, %s667_s18   ;;  %s593_s23 = sshll.u32 (!%p221_p7), %s584_s21, 2 }
  0x18   : > { %224 = sbr.rel (%p221_p7) target bundleno = 251 (0xfb), region = 59  ;;  %s592_s11 = sshll.u32 (!%p221_p7), %s227_s8, 6 }
  0x19   : > { %s229_s14 = scalar_lea.vmem (!%p221_p7), [#allocation2], %s592_s11  ;;  %p256_p8 = scmp.lt.s32.totalorder (!%p221_p7), %s593_s23, 55 }
  0x1d   : > { %v484_v8 = vld [vmem:[%s774_s2] sm:$0xff]  ;;  %v677_v9 = vmov 0   ;;  %v643_v13 = vld [vmem:[%s229_s14 + $0xc] ss:$16 sps:$4 sm:$0xff]   ;;  %v646_v15 = vld [vmem:[%s229_s14 + $0x8] ss:$16 sps:$4 sm:$0xff]  }
  0x1e   : > { %323 = vmatprep.mubr.bf16.mxu0 %v677_v9  ;;  %364 = vmatprep.mubr.bf16.mxu1 %v677_v9  ;;  %v508_v10 = vld [vmem:[%s776_s4] sm:$0xff]  ;;  %vm287_vm0 = vcmask 130048   ;;  %v650_v19 = vld [vmem:[%s229_s14 + $0x28] ss:$16 sps:$4 sm:$0xff]   ;;  %v652_v20 = vld [vmem:[%s229_s14 + $0x2c] ss:$16 sps:$4 sm:$0xff]  }
  0x1f   : > { %639 = vset.pattern.permute.xlu0 %v677_v9  ;;  %640 = vset.pattern.permute.xlu1 %v677_v9  ;;  %v641_v11 = vld [vmem:[%s229_s14 + $0x4] ss:$16 sps:$4 sm:$0xff]   ;;  %v645_v14 = vld [vmem:[%s229_s14] ss:$16 sps:$4 sm:$0xff]   ;;  %s782_s23 = smov (!%p256_p8, %s593_s23), 55 }
  0x20   : > { %487 = vperm.xlu0 %639, %v484_v8   ;;  %v498_v12 = vld [vmem:[%s775_s3] sm:$0xff]  ;;  %511 = vperm.xlu1 %640, %v508_v10   ;;  %s594_s20 = sshll.u32 %s782_s23, 3 }
  0x21   : > { %305 = vmatprep.subr.bf16.mxu0 %v641_v11  ;;  %346 = vmatprep.subr.bf16.mxu1 %v643_v13  ;;  %v262_v16 = vld [vmem:[%s773_s1] sm:$0xf]  ;;  %v649_v17 = vld [vmem:[%s229_s14 + $0x24] ss:$16 sps:$4 sm:$0xff]   ;;  %s259_s26 = scalar_lea.vmem %s777_s5, %s594_s20 }
  0x22   : > { %306 = vmatpush1.bf16.msra.mxu0 %v645_v14  ;;  %347 = vmatpush1.bf16.msra.mxu1 %v646_v15  ;;  %v647_v18 = vld [vmem:[%s229_s14 + $0x20] ss:$16 sps:$4 sm:$0xff]  }
  0x23   : > { %412 = vmatprep.subr.bf16.mxu0 %v649_v17  ;;  %453 = vmatprep.subr.bf16.mxu1 %v652_v20 }
  0x24   : > { %501 = vperm.xlu0 %639, %v498_v12  }
  0x25   : > { %599 = vmatmul.mubr.msk.bf16.vlgmr.msra.gmra.mxu0 %vm287_vm0, %v262_v16  ;;  %600 = vmatmul.mubr.msk.bf16.vlgmr.msra.gmra.mxu1 %vm287_vm0, %v262_v16 }
  0x26   : > { %413 = vmatpush1.bf16.msra.mxu0 %v647_v18  ;;  %454 = vmatpush1.bf16.msra.mxu1 %v650_v19 }
  0x27   : > { %430 = vmatprep.mubr.bf16.mxu0 %v677_v9  ;;  %471 = vmatprep.mubr.bf16.mxu1 %v677_v9 }
  0x2d   : > { %609 = vmatmul.mubr.msk.bf16.vlgmr.msra.gmra.mxu0 %vm287_vm0, %v262_v16  ;;  %610 = vmatmul.mubr.msk.bf16.vlgmr.msra.gmra.mxu1 %vm287_vm0, %v262_v16 }
  0x9b   : > { %v488_v29 = vpop.permute.xlu0 %487  ;;  %v512_v47 = vpop.permute.xlu1 %511 }
  0x9f   : > { %v502_v44 = vpop.permute.xlu0 %501 }
  0xe5   : > { %v325_v21 = vpop.f32.mrf.mxu0  ;;  %v366_v22 = vpop.f32.mrf.mxu1 }
  0xe7   : > { %v327_v23 = vpop.f32.mrf.mxu0  ;;  %v368_v24 = vpop.f32.mrf.mxu1 }
  0xe9   : > { %v329_v25 = vpop.f32.mrf.mxu0  ;;  %v370_v26 = vpop.f32.mrf.mxu1 }
  0xeb   : > { %v330_v27 = vpop.f32.mrf.mxu0  ;;  %v371_v28 = vpop.f32.mrf.mxu1 }
  0xed   : > { %v432_v30 = vpop.f32.mrf.mxu0  ;;  %v473_v31 = vpop.f32.mrf.mxu1 }
  0xee   : > { %v480_v32 = vmax.f32 %v325_v21, %v432_v30  ;;  %v482_v33 = vmax.f32 %v366_v22, %v473_v31 }
  0xef   : > { %v434_v34 = vpop.f32.mrf.mxu0  ;;  %v475_v35 = vpop.f32.mrf.mxu1 }
  0xf0   : > { %v490_v36 = vadd.f32 %v488_v29, %v480_v32  ;;  %v492_v37 = vadd.f32 %v488_v29, %v482_v33  ;;  %v481_v38 = vmax.f32 %v327_v23, %v434_v34  ;;  %v483_v39 = vmax.f32 %v368_v24, %v475_v35 }
  0xf1   : > { %v436_v40 = vpop.f32.mrf.mxu0  ;;  %v477_v41 = vpop.f32.mrf.mxu1 }
  0xf2   : > { %v491_v42 = vadd.f32 %v488_v29, %v481_v38  ;;  %v493_v43 = vadd.f32 %v488_v29, %v483_v39  ;;  %v494_v45 = vmax.f32 %v490_v36, 0.0  ;;  %v496_v46 = vmax.f32 %v492_v37, 0.0 }
  0xf3   : > { %v437_v48 = vpop.f32.mrf.mxu0  ;;  %v478_v49 = vpop.f32.mrf.mxu1 }
  0xf4   : > { %v495_v50 = vmax.f32 %v491_v42, 0.0  ;;  %v497_v51 = vmax.f32 %v493_v43, 0.0  ;;  %v504_v52 = vmul.f32 %v502_v44, %v494_v45  ;;  %v506_v53 = vmul.f32 %v502_v44, %v496_v46 }
  0xf6   : > { %v505_v54 = vmul.f32 %v502_v44, %v495_v50  ;;  %v507_v55 = vmul.f32 %v502_v44, %v497_v51  ;;  %v514_v56 = vadd.f32 %v512_v47, %v504_v52  ;;  %v516_v57 = vadd.f32 %v512_v47, %v506_v53 }
  0xf8   : > { %v515_v58 = vadd.f32 %v512_v47, %v505_v54  ;;  %v517_v59 = vadd.f32 %v512_v47, %v507_v55  ;;  %518 = vst [vmem:[%s259_s26] sm:$0xff] %v514_v56  ;;  %520 = vst [vmem:[%s259_s26 + $0x10] sm:$0xff] %v516_v57 }
  0xfa   : > { %519 = vst [vmem:[%s259_s26 + $0x8] sm:$0xff] %v515_v58  ;;  %521 = vst [vmem:[%s259_s26 + $0x18] sm:$0xff] %v517_v59 }
  0xfb PF: > { %p12_p9 = scmp.ge.s32.totalorder %s725_s22, 16   ;;  %s778_s18 = smov %s671_s19 }
  0xfc   : > { %s779_s19 = smov %s734_s25  ;;  %s780_s20 = smov %s725_s22 }
  0xfd   :  { %14 = sbr.rel (!%p12_p9) target bundleno = 2 (0x2), region = 99 }

// kernel: cnn_forward.8
= control target key start
LH: loop header
LB: loop body
LE: loop exit
PB: predicated region body
PF: predicated region fallthrough
CT: control target
= control target key end

     0   :  { %s798_s18 = smov 0   ;;  %s800_s19 = smov 0   ;;  %s905_s0 = inlined_call_operand.vmem [shape: bf16[2,16,3584], index: 0, kind: input, shape index: {}]   ;;  %s906_s1 = inlined_call_operand.vmem [shape: bf16[16,16], index: 1, kind: input, shape index: {}]   ;;  %s907_s2 = inlined_call_operand.vmem [shape: f32[16,1], index: 2, kind: input, shape index: {}]   ;;  %s908_s3 = inlined_call_operand.vmem [shape: f32[16,1], index: 3, kind: input, shape index: {}]   ;;  %s909_s4 = inlined_call_operand.vmem [shape: f32[16,1], index: 4, kind: input, shape index: {}]   ;;  %s910_s5 = inlined_call_operand.vmem [shape: f32[16,3584], index: 5, kind: output, shape index: {}]  }
   0x1   :  { %s802_s20 = smov 0  }
   0x2 LB: > { %s669_s21 = sadd.s32 4294967295, %s765_s20   ;;  %s815_s22 = sadd.s32 1, %s765_s20   ;;  %s765_s20 = sphi %s802_s20, %s914_s20   ;;  %s761_s19 = sphi %s800_s19, %s913_s19   ;;  %s757_s18 = sphi %s798_s18, %s912_s18  }
   0x3   : > { %s19_s23 = ssub.s32 %s765_s20, %s815_s22  ;;  %s22_s24 = sadd.s32 1, %s761_s19 }
   0x4   : > { %p20_p0 = scmp.eq.s32.totalorder %s19_s23, 0  ;;  %p29_p1 = scmp.ne.s32.totalorder %s761_s19, %s757_s18 }
   0x5   : > { %p30_p2 = scmp.eq.s32.totalorder %s765_s20, 0  ;;  %p143_p3 = scmp.eq.s32.totalorder %s669_s21, 6 }
   0x6   : > { %s826_s25 = scalar_select %p20_p0, %s761_s19, %s22_s24  }
   0x7   : > { %p31_p4 = por %p30_p2, %p29_p1  ;;  %p828_p5 = por %p143_p3, %p29_p1 }
   0x8   : > { %p672_p6 = scmp.ge.s32.totalorder %s765_s20, 7 }
   0xa   : > { %177 = sbr.rel (%p672_p6) target bundleno = 23 (0x17), region = 32 }
   0xf   : > { %180 = sbr.rel (!%p31_p4) target bundleno = 23 (0x17), region = 36  ;;  %s182_s27 = sand.u32 (%p31_p4), 1, %s761_s19  }
  0x10   : > { %s701_s28 = sshll.u32 (%p31_p4), %s765_s20, 4  ;;  %s673_s29 = sshll.u32 (%p31_p4), %s182_s27, 6 }
  0x11   : > { %s187_s7 = scalar_lea.vmem (%p31_p4), %s905_s0, %s701_s28  ;;  %s184_s8 = scalar_lea.vmem (%p31_p4), [#allocation2], %s673_s29 }
  0x12   : > { %v200_v0 = vld [vmem:[%s187_s7] sm:$0xff] (%p31_p4)  ;;  %v202_v1 = vld [vmem:[%s187_s7 + $0x8] sm:$0xff] (%p31_p4)  ;;  %v204_v2 = vld [vmem:[%s187_s7 + $0x70] sm:$0xff] (%p31_p4) }
  0x13   : > { %201 = vst [vmem:[%s184_s8] sm:$0xff] (%p31_p4), %v200_v0  ;;  %203 = vst [vmem:[%s184_s8 + $0x8] sm:$0xff] (%p31_p4), %v202_v1  ;;  %v206_v3 = vld [vmem:[%s187_s7 + $0x78] sm:$0xff] (%p31_p4)  ;;  %v208_v4 = vld [vmem:[%s187_s7 + $0xe0] sm:$0xff] (%p31_p4) }
  0x14   : > { %205 = vst [vmem:[%s184_s8 + $0x10] sm:$0xff] %v204_v2  ;;  %v210_v5 = vld [vmem:[%s187_s7 + $0xe8] sm:$0xff]  ;;  %207 = vst [vmem:[%s184_s8 + $0x18] sm:$0xff] %v206_v3  ;;  %v212_v6 = vld [vmem:[%s187_s7 + $0x150] sm:$0xff] }
  0x15   : > { %209 = vst [vmem:[%s184_s8 + $0x20] sm:$0xff] %v208_v4  ;;  %211 = vst [vmem:[%s184_s8 + $0x28] sm:$0xff] %v210_v5  ;;  %v214_v7 = vld [vmem:[%s187_s7 + $0x158] sm:$0xff] }
  0x16   : > { %213 = vst [vmem:[%s184_s8 + $0x30] sm:$0xff] %v212_v6  ;;  %215 = vst [vmem:[%s184_s8 + $0x38] sm:$0xff] %v214_v7 }
  0x17 PF: > { %p676_p7 = scmp.ge.s32.totalorder %s765_s20, 1  ;;  %p220_p8 = scmp.lt.s32.totalorder %s765_s20, 8 }
  0x19   : > { %p221_p9 = pnand %p676_p7, %p220_p8 }
  0x1a   : > { %s227_s9 = sand.u32 (!%p221_p9), 1, %s757_s18  }
  0x1b   : > { %224 = sbr.rel (%p221_p9) target bundleno = 267 (0x10b), region = 59  ;;  %s841_s10 = sshll.u32 (!%p221_p9), %s227_s9, 6 }
  0x1c   : > { %s229_s15 = scalar_lea.vmem (!%p221_p9), [#allocation2], %s841_s10  ;;  %s870_s7 = scalar_lea.vmem (!%p221_p9), [#allocation3], %s841_s10 }
  0x20   : > { %v767_v8 = vmov 0   ;;  %v496_v9 = vld [vmem:[%s907_s2] sm:$0xff]  ;;  %v497_v12 = vld [vmem:[%s907_s2 + $0x8] sm:$0xff]  ;;  %vm287_vm0 = vcmask 130048   ;;  %s702_s8 = sshll.u32 (%p828_p5), %s669_s21, 5 }
  0x21   : > { %323 = vmatprep.mubr.bf16.mxu0 %v767_v8  ;;  %366 = vmatprep.mubr.bf16.mxu1 %v767_v8  ;;  %v524_v10 = vld [vmem:[%s908_s3] sm:$0xff]  ;;  %v732_v13 = vld [vmem:[%s229_s15 + $0xc] ss:$16 sps:$4 sm:$0xff]   ;;  %v735_v16 = vld [vmem:[%s229_s15 + $0x8] ss:$16 sps:$4 sm:$0xff]   ;;  %s581_s11 = scalar_lea.vmem (%p828_p5), %s910_s5, %s702_s8 }
  0x22   : > { %728 = vset.pattern.permute.xlu0 %v767_v8  ;;  %729 = vset.pattern.permute.xlu1 %v767_v8  ;;  %v730_v11 = vld [vmem:[%s229_s15 + $0x4] ss:$16 sps:$4 sm:$0xff]   ;;  %v734_v15 = vld [vmem:[%s229_s15] ss:$16 sps:$4 sm:$0xff]   ;;  %v525_v18 = vld [vmem:[%s908_s3 + $0x8] sm:$0xff] }
  0x23   : > { %500 = vperm.xlu0 %728, %v496_v9   ;;  %528 = vperm.xlu1 %729, %v524_v10   ;;  %v736_v14 = vld [vmem:[%s906_s1] sm:$0xff]   ;;  %v740_v20 = vld [vmem:[%s229_s15 + $0x28] ss:$16 sps:$4 sm:$0xff]   ;;  %v742_v21 = vld [vmem:[%s229_s15 + $0x2c] ss:$16 sps:$4 sm:$0xff]  }
  0x24   : > { %305 = vmatprep.subr.bf16.mxu0 %v730_v11  ;;  %348 = vmatprep.subr.bf16.mxu1 %v732_v13  ;;  %v739_v17 = vld [vmem:[%s229_s15 + $0x24] ss:$16 sps:$4 sm:$0xff]   ;;  %v737_v19 = vld [vmem:[%s229_s15 + $0x20] ss:$16 sps:$4 sm:$0xff]   ;;  %v545_v23 = vld [vmem:[%s909_s4 + $0x8] sm:$0xff] }
  0x25   : > { %306 = vmatpush1.bf16.msra.mxu0 %v734_v15  ;;  %349 = vmatpush1.bf16.msra.mxu1 %v735_v16  ;;  %v544_v22 = vld [vmem:[%s909_s4] sm:$0xff] }
  0x26   : > { %416 = vmatprep.subr.bf16.mxu0 %v739_v17  ;;  %459 = vmatprep.subr.bf16.mxu1 %v742_v21 }
  0x27   : > { %505 = vperm.xlu0 %728, %v497_v12   ;;  %533 = vperm.xlu1 %729, %v525_v18  }
  0x28   : > { %684 = vmatmul.mubr.msk.bf16.vlgmr.msra.gmra.mxu0 %vm287_vm0, %v736_v14  ;;  %685 = vmatmul.mubr.msk.bf16.vlgmr.msra.gmra.mxu1 %vm287_vm0, %v736_v14 }
  0x29   : > { %417 = vmatpush1.bf16.msra.mxu0 %v737_v19  ;;  %460 = vmatpush1.bf16.msra.mxu1 %v740_v20 }
  0x2a   : > { %434 = vmatprep.mubr.bf16.mxu0 %v767_v8  ;;  %477 = vmatprep.mubr.bf16.mxu1 %v767_v8 }
  0x2b   : > { %548 = vperm.xlu0 %728, %v544_v22   ;;  %553 = vperm.xlu1 %729, %v545_v23  }
  0x30   : > { %694 = vmatmul.mubr.msk.bf16.vlgmr.msra.gmra.mxu0 %vm287_vm0, %v736_v14  ;;  %695 = vmatmul.mubr.msk.bf16.vlgmr.msra.gmra.mxu1 %vm287_vm0, %v736_v14 }
  0x9e   : > { %v501_v28 = vpop.permute.xlu0 %500  ;;  %v529_v35 = vpop.permute.xlu1 %528 }
  0xa2   : > { %v506_v38 = vpop.permute.xlu0 %505  ;;  %v534_v59 = vpop.permute.xlu1 %533 }
  0xa6   : > { %v549_v62 = vpop.permute.xlu0 %548  ;;  %v554_v15 = vpop.permute.xlu1 %553 }
  0xe8   : > { %v325_v24 = vpop.f32.mrf.mxu0  ;;  %v368_v25 = vpop.f32.mrf.mxu1 }
  0xea   : > { %v327_v26 = vpop.f32.mrf.mxu0  ;;  %v370_v27 = vpop.f32.mrf.mxu1 }
  0xec   : > { %v329_v29 = vpop.f32.mrf.mxu0  ;;  %v372_v30 = vpop.f32.mrf.mxu1 }
  0xee   : > { %v331_v31 = vpop.f32.mrf.mxu0  ;;  %v374_v32 = vpop.f32.mrf.mxu1 }
  0xf0   : > { %v436_v33 = vpop.f32.mrf.mxu0  ;;  %v479_v34 = vpop.f32.mrf.mxu1 }
  0xf1   : > { %v488_v36 = vmax.f32 %v325_v24, %v436_v33  ;;  %v490_v37 = vmax.f32 %v368_v25, %v479_v34 }
  0xf2   : > { %v438_v39 = vpop.f32.mrf.mxu0  ;;  %v481_v40 = vpop.f32.mrf.mxu1 }
  0xf3   : > { %v508_v41 = vadd.f32 %v501_v28, %v488_v36  ;;  %v510_v42 = vadd.f32 %v501_v28, %v490_v37  ;;  %v489_v43 = vmax.f32 %v327_v26, %v438_v39  ;;  %v491_v44 = vmax.f32 %v370_v27, %v481_v40 }
  0xf4   : > { %v440_v45 = vpop.f32.mrf.mxu0  ;;  %v483_v46 = vpop.f32.mrf.mxu1 }
  0xf5   : > { %v516_v47 = vmax.f32 %v508_v41, 0.0  ;;  %v518_v48 = vmax.f32 %v510_v42, 0.0  ;;  %v509_v49 = vadd.f32 %v501_v28, %v489_v43  ;;  %v511_v50 = vadd.f32 %v501_v28, %v491_v44 }
  0xf6   : > { %v492_v51 = vmax.f32 %v329_v29, %v440_v45  ;;  %v494_v52 = vmax.f32 %v372_v30, %v483_v46  ;;  %v442_v53 = vpop.f32.mrf.mxu0  ;;  %v485_v54 = vpop.f32.mrf.mxu1 }
  0xf7   : > { %v536_v55 = vmul.f32 %v529_v35, %v516_v47  ;;  %v538_v56 = vmul.f32 %v529_v35, %v518_v48  ;;  %v517_v57 = vmax.f32 %v509_v49, 0.0  ;;  %v519_v58 = vmax.f32 %v511_v50, 0.0 }
  0xf8   : > { %v512_v60 = vadd.f32 %v506_v38, %v492_v51  ;;  %v514_v61 = vadd.f32 %v506_v38, %v494_v52  ;;  %v493_v63 = vmax.f32 %v331_v31, %v442_v53  ;;  %v495_v0 = vmax.f32 %v374_v32, %v485_v54 }
  0xf9   : > { %v537_v1 = vmul.f32 %v529_v35, %v517_v57  ;;  %v539_v2 = vmul.f32 %v529_v35, %v519_v58  ;;  %v556_v3 = vadd.f32 %v549_v62, %v536_v55  ;;  %v558_v4 = vadd.f32 %v549_v62, %v538_v56 }
  0xfa   : > { %v520_v5 = vmax.f32 %v512_v60, 0.0  ;;  %v522_v6 = vmax.f32 %v514_v61, 0.0  ;;  %v513_v7 = vadd.f32 %v506_v38, %v493_v63  ;;  %v515_v8 = vadd.f32 %v506_v38, %v495_v0 }
  0xfb   : > { %v557_v9 = vadd.f32 %v549_v62, %v537_v1  ;;  %v559_v10 = vadd.f32 %v549_v62, %v539_v2  ;;  %564 = vst [vmem:[%s870_s7] sm:$0xff] %v556_v3  ;;  %566 = vst [vmem:[%s870_s7 + $0x10] sm:$0xff] %v558_v4 }
  0xfc   : > { %v540_v11 = vmul.f32 %v534_v59, %v520_v5  ;;  %v542_v12 = vmul.f32 %v534_v59, %v522_v6  ;;  %v521_v13 = vmax.f32 %v513_v7, 0.0  ;;  %v523_v14 = vmax.f32 %v515_v8, 0.0 }
  0xfd   : > { %565 = vst [vmem:[%s870_s7 + $0x8] sm:$0xff] %v557_v9  ;;  %567 = vst [vmem:[%s870_s7 + $0x18] sm:$0xff] %v559_v10 }
  0xfe   : > { %v541_v16 = vmul.f32 %v534_v59, %v521_v13  ;;  %v543_v17 = vmul.f32 %v534_v59, %v523_v14  ;;  %v560_v18 = vadd.f32 %v554_v15, %v540_v11  ;;  %v562_v19 = vadd.f32 %v554_v15, %v542_v12  ;;  %578 = sbr.rel (!%p828_p5) target bundleno = 267 (0x10b), region = 67 }
 0x100   : > { %v561_v20 = vadd.f32 %v554_v15, %v541_v16  ;;  %v563_v21 = vadd.f32 %v554_v15, %v543_v17  ;;  %568 = vst [vmem:[%s870_s7 + $0x20] sm:$0xff] %v560_v18  ;;  %570 = vst [vmem:[%s870_s7 + $0x30] sm:$0xff] %v562_v19 }
 0x102   : > { %569 = vst [vmem:[%s870_s7 + $0x28] sm:$0xff] %v561_v20  ;;  %571 = vst [vmem:[%s870_s7 + $0x38] sm:$0xff] %v563_v21  ;;  %v594_v22 = vld [vmem:[%s870_s7] sm:$0xff] (%p828_p5)  ;;  %v598_v24 = vld [vmem:[%s870_s7 + $0x10] sm:$0xff] (%p828_p5) }
 0x103   : > { %595 = vst [vmem:[%s581_s11] sm:$0xff] %v594_v22  ;;  %599 = vst [vmem:[%s581_s11 + $0x10] sm:$0xff] %v598_v24 }
 0x104   : > { %v596_v23 = vld [vmem:[%s870_s7 + $0x8] sm:$0xff]  ;;  %v600_v25 = vld [vmem:[%s870_s7 + $0x18] sm:$0xff] }
 0x105   : > { %597 = vst [vmem:[%s581_s11 + $0x8] sm:$0xff] %v596_v23  ;;  %601 = vst [vmem:[%s581_s11 + $0x18] sm:$0xff] %v600_v25 }
 0x107   : > { %v602_v26 = vld [vmem:[%s870_s7 + $0x20] sm:$0xff]  ;;  %v606_v28 = vld [vmem:[%s870_s7 + $0x30] sm:$0xff] }
 0x108   : > { %603 = vst [vmem:[%s581_s11 + $0xe0] sm:$0xff] %v602_v26  ;;  %607 = vst [vmem:[%s581_s11 + $0xf0] sm:$0xff] %v606_v28 }
 0x109   : > { %v604_v27 = vld [vmem:[%s870_s7 + $0x28] sm:$0xff]  ;;  %v608_v29 = vld [vmem:[%s870_s7 + $0x38] sm:$0xff] }
 0x10a   : > { %605 = vst [vmem:[%s581_s11 + $0xe8] sm:$0xff] %v604_v27  ;;  %609 = vst [vmem:[%s581_s11 + $0xf8] sm:$0xff] %v608_v29 }
 0x10b PF: > { %p12_p10 = scmp.ge.s32.totalorder %s815_s22, 9   ;;  %s912_s18 = smov %s761_s19 }
 0x10c   : > { %s913_s19 = smov %s826_s25  ;;  %s914_s20 = smov %s815_s22 }
 0x10d   :  { %14 = sbr.rel (!%p12_p10) target bundleno = 2 (0x2), region = 122 }

// kernel: cnn_forward.9
= control target key start
LH: loop header
LB: loop body
LE: loop exit
PB: predicated region body
PF: predicated region fallthrough
CT: control target
= control target key end

     0   :  { %s708_s18 = smov 0   ;;  %s710_s19 = smov 0   ;;  %s793_s0 = inlined_call_operand.vmem [shape: bf16[2,32,1792], index: 0, kind: input, shape index: {}]   ;;  %s794_s1 = inlined_call_operand.vmem [shape: bf16[16,32], index: 1, kind: input, shape index: {}]   ;;  %s795_s2 = inlined_call_operand.vmem [shape: f32[16,1], index: 2, kind: input, shape index: {}]   ;;  %s796_s3 = inlined_call_operand.vmem [shape: f32[16,1], index: 3, kind: input, shape index: {}]   ;;  %s797_s4 = inlined_call_operand.vmem [shape: f32[16,1], index: 4, kind: input, shape index: {}]   ;;  %s798_s5 = inlined_call_operand.vmem [shape: f32[16,1792], index: 5, kind: output, shape index: {}]  }
   0x1   :  { %s712_s20 = smov 0  }
   0x2 LB: > { %s581_s21 = sadd.s32 4294967295, %s675_s20   ;;  %s725_s22 = sadd.s32 1, %s675_s20   ;;  %s675_s20 = sphi %s712_s20, %s802_s20   ;;  %s671_s19 = sphi %s710_s19, %s801_s19   ;;  %s667_s18 = sphi %s708_s18, %s800_s18  }
   0x3   : > { %s19_s23 = ssub.s32 %s675_s20, %s725_s22  ;;  %s22_s24 = sadd.s32 1, %s671_s19 }
   0x4   : > { %p20_p0 = scmp.eq.s32.totalorder %s19_s23, 0  ;;  %p29_p1 = scmp.ne.s32.totalorder %s671_s19, %s667_s18 }
   0x5   : > { %p30_p2 = scmp.eq.s32.totalorder %s675_s20, 0  ;;  %p143_p3 = scmp.eq.s32.totalorder %s581_s21, 6 }
   0x6   : > { %s736_s25 = scalar_select %p20_p0, %s671_s19, %s22_s24  }
   0x7   : > { %p31_p4 = por %p30_p2, %p29_p1  ;;  %p738_p5 = por %p143_p3, %p29_p1 }
   0x8   : > { %p584_p6 = scmp.ge.s32.totalorder %s675_s20, 7 }
   0xa   : > { %177 = sbr.rel (%p584_p6) target bundleno = 23 (0x17), region = 32 }
   0xf   : > { %180 = sbr.rel (!%p31_p4) target bundleno = 23 (0x17), region = 36  ;;  %s182_s27 = sand.u32 (%p31_p4), 1, %s671_s19  }
  0x10   : > { %s611_s28 = sshll.u32 (%p31_p4), %s675_s20, 3  ;;  %s585_s29 = sshll.u32 (%p31_p4), %s182_s27, 6 }
  0x11   : > { %s187_s7 = scalar_lea.vmem (%p31_p4), %s793_s0, %s611_s28  ;;  %s184_s8 = scalar_lea.vmem (%p31_p4), [#allocation2], %s585_s29 }
  0x12   : > { %v230_v0 = vld [vmem:[%s187_s7] sm:$0xff] (%p31_p4)  ;;  %v232_v1 = vld [vmem:[%s187_s7 + $0x38] sm:$0xff] (%p31_p4)  ;;  %v234_v2 = vld [vmem:[%s187_s7 + $0x70] sm:$0xff] (%p31_p4) }
  0x13   : > { %231 = vst [vmem:[%s184_s8] sm:$0xff] (%p31_p4), %v230_v0  ;;  %233 = vst [vmem:[%s184_s8 + $0x8] sm:$0xff] (%p31_p4), %v232_v1  ;;  %v236_v3 = vld [vmem:[%s187_s7 + $0xa8] sm:$0xff] (%p31_p4)  ;;  %v238_v4 = vld [vmem:[%s187_s7 + $0xe0] sm:$0xff] (%p31_p4) }
  0x14   : > { %235 = vst [vmem:[%s184_s8 + $0x10] sm:$0xff] %v234_v2  ;;  %v240_v5 = vld [vmem:[%s187_s7 + $0x118] sm:$0xff]  ;;  %237 = vst [vmem:[%s184_s8 + $0x18] sm:$0xff] %v236_v3  ;;  %v242_v6 = vld [vmem:[%s187_s7 + $0x150] sm:$0xff] }
  0x15   : > { %239 = vst [vmem:[%s184_s8 + $0x20] sm:$0xff] %v238_v4  ;;  %241 = vst [vmem:[%s184_s8 + $0x28] sm:$0xff] %v240_v5  ;;  %v244_v7 = vld [vmem:[%s187_s7 + $0x188] sm:$0xff] }
  0x16   : > { %243 = vst [vmem:[%s184_s8 + $0x30] sm:$0xff] %v242_v6  ;;  %245 = vst [vmem:[%s184_s8 + $0x38] sm:$0xff] %v244_v7 }
  0x17 PF: > { %p588_p7 = scmp.ge.s32.totalorder %s675_s20, 1  ;;  %p250_p8 = scmp.lt.s32.totalorder %s675_s20, 8 }
  0x19   : > { %p251_p9 = pnand %p588_p7, %p250_p8 }
  0x1a   : > { %s257_s9 = sand.u32 (!%p251_p9), 1, %s667_s18  }
  0x1b   : > { %254 = sbr.rel (%p251_p9) target bundleno = 262 (0x106), region = 74  ;;  %s589_s10 = sshll.u32 (!%p251_p9), %s257_s9, 6 }
  0x1c   : > { %s259_s15 = scalar_lea.vmem (!%p251_p9), [#allocation2], %s589_s10  ;;  %s590_s8 = sshll.u32 (!%p251_p9), %s257_s9, 5 }
  0x1d   : > { %s282_s10 = scalar_lea.vmem (!%p251_p9), [#allocation3], %s590_s8 }
  0x20   : > { %v677_v8 = vmov 0   ;;  %v436_v9 = vld [vmem:[%s795_s2] sm:$0xff]  ;;  %v640_v11 = vld [vmem:[%s259_s15 + $0x14] ss:$8 sps:$4 sm:$0xff]   ;;  %v437_v12 = vld [vmem:[%s795_s2 + $0x8] sm:$0xff]  ;;  %vm317_vm0 = vcmask 261120  }
  0x21   : > { %353 = vmatprep.mubr.bf16.mxu0 %v677_v8  ;;  %421 = vmatprep.mubr.bf16.mxu1 %v677_v8  ;;  %v456_v10 = vld [vmem:[%s796_s3] sm:$0xff]  ;;  %v642_v13 = vld [vmem:[%s259_s15 + $0x34] ss:$8 sps:$4 sm:$0xff]   ;;  %v457_v14 = vld [vmem:[%s796_s3 + $0x8] sm:$0xff]  ;;  %s612_s18 = sshll.u32 (%p738_p5), %s581_s21, 4 }
  0x22   : > { %638 = vset.pattern.permute.xlu0 %v677_v8  ;;  %639 = vset.pattern.permute.xlu1 %v677_v8  ;;  %v644_v15 = vld [vmem:[%s259_s15 + $0x10] ss:$8 sps:$4 sm:$0xff]   ;;  %v646_v17 = vld [vmem:[%s259_s15 + $0x4] ss:$8 sps:$4 sm:$0xff]   ;;  %v650_v19 = vld [vmem:[%s259_s15] ss:$8 sps:$4 sm:$0xff]   ;;  %s501_s12 = scalar_lea.vmem (%p738_p5), %s798_s5, %s612_s18 }
  0x23   : > { %440 = vperm.xlu0 %638, %v436_v9   ;;  %460 = vperm.xlu1 %639, %v456_v10   ;;  %v645_v16 = vld [vmem:[%s259_s15 + $0x30] ss:$8 sps:$4 sm:$0xff]   ;;  %v648_v18 = vld [vmem:[%s259_s15 + $0x24] ss:$8 sps:$4 sm:$0xff]   ;;  %v651_v20 = vld [vmem:[%s259_s15 + $0x20] ss:$8 sps:$4 sm:$0xff]  }
  0x24   : > { %333 = vmatprep.subr.bf16.mxu0 %v640_v11  ;;  %401 = vmatprep.subr.bf16.mxu1 %v642_v13  ;;  %v472_v21 = vld [vmem:[%s797_s4] sm:$0xff]  ;;  %v473_v23 = vld [vmem:[%s797_s4 + $0x8] sm:$0xff] }
  0x25   : > { %334 = vmatpush1.bf16.msra.mxu0 %v644_v15  ;;  %402 = vmatpush1.bf16.msra.mxu1 %v645_v16  ;;  %v652_v22 = vld [vmem:[%s794_s1] sm:$0xff]  }
  0x26   : > { %335 = vmatprep.subr.bf16.mxu0 %v646_v17  ;;  %403 = vmatprep.subr.bf16.mxu1 %v648_v18 }
  0x27   : > { %445 = vperm.xlu0 %638, %v437_v12   ;;  %465 = vperm.xlu1 %639, %v457_v14  }
  0x29   : > { %336 = vmatpush1.bf16.msra.mxu0 %v650_v19  ;;  %404 = vmatpush1.bf16.msra.mxu1 %v651_v20 }
  0x2b   : > { %476 = vperm.xlu0 %638, %v472_v21   ;;  %481 = vperm.xlu1 %639, %v473_v23  }
  0x2c   : > { %596 = vmatmul.mubr.msk.bf16.vlgmr.msra.gmra.mxu0 %vm317_vm0, %v652_v22  ;;  %605 = vmatmul.mubr.msk.bf16.vlgmr.msra.gmra.mxu1 %vm317_vm0, %v652_v22 }
  0x9e   : > { %v441_v24 = vpop.permute.xlu0 %440  ;;  %v461_v25 = vpop.permute.xlu1 %460 }
  0xa2   : > { %v446_v28 = vpop.permute.xlu0 %445  ;;  %v466_v37 = vpop.permute.xlu1 %465 }
  0xa6   : > { %v477_v46 = vpop.permute.xlu0 %476  ;;  %v482_v54 = vpop.permute.xlu1 %481 }
  0xec   : > { %v355_v26 = vpop.f32.mrf.mxu0  ;;  %v423_v27 = vpop.f32.mrf.mxu1 }
  0xed   : > { %v432_v29 = vmax.f32 %v355_v26, %v423_v27 }
  0xee   : > { %v357_v30 = vpop.f32.mrf.mxu0  ;;  %v425_v31 = vpop.f32.mrf.mxu1 }
  0xef   : > { %v448_v32 = vadd.f32 %v441_v24, %v432_v29  ;;  %v433_v33 = vmax.f32 %v357_v30, %v425_v31 }
  0xf0   : > { %v359_v34 = vpop.f32.mrf.mxu0  ;;  %v427_v35 = vpop.f32.mrf.mxu1 }
  0xf1   : > { %v452_v36 = vmax.f32 %v448_v32, 0.0  ;;  %v449_v38 = vadd.f32 %v441_v24, %v433_v33  ;;  %v434_v39 = vmax.f32 %v359_v34, %v427_v35 }
  0xf2   : > { %v361_v40 = vpop.f32.mrf.mxu0  ;;  %v429_v41 = vpop.f32.mrf.mxu1 }
  0xf3   : > { %v453_v42 = vmax.f32 %v449_v38, 0.0  ;;  %v468_v43 = vmul.f32 %v461_v25, %v452_v36  ;;  %v450_v44 = vadd.f32 %v446_v28, %v434_v39  ;;  %v435_v45 = vmax.f32 %v361_v40, %v429_v41 }
  0xf5   : > { %v469_v47 = vmul.f32 %v461_v25, %v453_v42  ;;  %v484_v48 = vadd.f32 %v477_v46, %v468_v43  ;;  %v454_v49 = vmax.f32 %v450_v44, 0.0  ;;  %v451_v50 = vadd.f32 %v446_v28, %v435_v45 }
  0xf7   : > { %v485_v51 = vadd.f32 %v477_v46, %v469_v47  ;;  %488 = vst [vmem:[%s282_s10] sm:$0xff] %v484_v48  ;;  %v470_v52 = vmul.f32 %v466_v37, %v454_v49  ;;  %v455_v53 = vmax.f32 %v451_v50, 0.0 }
  0xf9   : > { %489 = vst [vmem:[%s282_s10 + $0x8] sm:$0xff] %v485_v51  ;;  %v486_v55 = vadd.f32 %v482_v54, %v470_v52  ;;  %v471_v56 = vmul.f32 %v466_v37, %v455_v53  ;;  %498 = sbr.rel (!%p738_p5) target bundleno = 262 (0x106), region = 82 }
  0xfb   : > { %490 = vst [vmem:[%s282_s10 + $0x10] sm:$0xff] %v486_v55  ;;  %v487_v57 = vadd.f32 %v482_v54, %v471_v56 }
  0xfd   : > { %491 = vst [vmem:[%s282_s10 + $0x18] sm:$0xff] %v487_v57 }
  0xfe   : > { %v514_v58 = vld [vmem:[%s282_s10] sm:$0xff] }
  0xff   : > { %515 = vst [vmem:[%s501_s12] sm:$0xff] %v514_v58 }
 0x100   : > { %v516_v59 = vld [vmem:[%s282_s10 + $0x8] sm:$0xff] }
 0x101   : > { %517 = vst [vmem:[%s501_s12 + $0x8] sm:$0xff] %v516_v59 }
 0x102   : > { %v518_v60 = vld [vmem:[%s282_s10 + $0x10] sm:$0xff] }
 0x103   : > { %519 = vst [vmem:[%s501_s12 + $0x70] sm:$0xff] %v518_v60 }
 0x104   : > { %v520_v61 = vld [vmem:[%s282_s10 + $0x18] sm:$0xff] }
 0x105   : > { %521 = vst [vmem:[%s501_s12 + $0x78] sm:$0xff] %v520_v61 }
 0x106 PF: > { %p12_p10 = scmp.ge.s32.totalorder %s725_s22, 9   ;;  %s800_s18 = smov %s671_s19 }
 0x107   : > { %s801_s19 = smov %s736_s25  ;;  %s802_s20 = smov %s725_s22 }
 0x108   :  { %14 = sbr.rel (!%p12_p10) target bundleno = 2 (0x2), region = 137 }

// kernel: cnn_forward.10
= control target key start
LH: loop header
LB: loop body
LE: loop exit
PB: predicated region body
PF: predicated region fallthrough
CT: control target
= control target key end

     0   :  { %s1258_s18 = smov 0   ;;  %s1260_s19 = smov 0   ;;  %s1524_s0 = inlined_call_operand.vmem [shape: bf16[4,64,512], index: 0, kind: input, shape index: {}]   ;;  %s1525_s1 = inlined_call_operand.vmem [shape: bf16[32,64], index: 1, kind: input, shape index: {}]   ;;  %s1526_s2 = inlined_call_operand.vmem [shape: f32[32,1], index: 2, kind: input, shape index: {}]   ;;  %s1527_s3 = inlined_call_operand.vmem [shape: f32[32,1], index: 3, kind: input, shape index: {}]   ;;  %s1528_s4 = inlined_call_operand.vmem [shape: f32[32,1], index: 4, kind: input, shape index: {}]   ;;  %s1529_s5 = inlined_call_operand.vmem [shape: f32[32,512], index: 5, kind: output, shape index: {}]  }
   0x1   :  { %s1262_s20 = smov 0  }
   0x2 LB: > { %s1043_s21 = sadd.s32 4294967295, %s1225_s20   ;;  %s1275_s22 = sadd.s32 1, %s1225_s20   ;;  %s1225_s20 = sphi %s1262_s20, %s1533_s20   ;;  %s1221_s19 = sphi %s1260_s19, %s1532_s19   ;;  %s1217_s18 = sphi %s1258_s18, %s1531_s18  }
   0x3   : > { %s19_s23 = ssub.s32 %s1225_s20, %s1275_s22  ;;  %s22_s24 = sadd.s32 1, %s1221_s19 }
   0x4   : > { %p20_p0 = scmp.eq.s32.totalorder %s19_s23, 0  ;;  %p29_p1 = scmp.ne.s32.totalorder %s1221_s19, %s1217_s18 }
   0x5   : > { %p30_p2 = scmp.eq.s32.totalorder %s1225_s20, 0  ;;  %p143_p3 = scmp.eq.s32.totalorder %s1043_s21, 1 }
   0x6   : > { %s1286_s25 = scalar_select %p20_p0, %s1221_s19, %s22_s24  }
   0x7   : > { %p31_p4 = por %p30_p2, %p29_p1  ;;  %p1288_p5 = por %p143_p3, %p29_p1 }
   0x8   : > { %p1046_p6 = scmp.ge.s32.totalorder %s1225_s20, 2 }
   0xa   : > { %177 = sbr.rel (%p1046_p6) target bundleno = 35 (0x23), region = 32 }
   0xf   : > { %180 = sbr.rel (!%p31_p4) target bundleno = 35 (0x23), region = 36  ;;  %s182_s27 = sand.u32 (%p31_p4), 1, %s1221_s19  }
  0x10   : > { %s1124_s28 = sshll.u32 (%p31_p4), %s1225_s20, 3  ;;  %s1047_s29 = sshll.u32 (%p31_p4), %s182_s27, 8 }
  0x11   : > { %s1298_s7 = scalar_lea.vmem (%p31_p4), %s1524_s0, %s1124_s28  ;;  %s1303_s8 = scalar_lea.vmem (%p31_p4), [#allocation2], %s1047_s29 }
  0x12   : > { %v278_v0 = vld [vmem:[%s1298_s7] sm:$0xff] (%p31_p4)  ;;  %v280_v1 = vld [vmem:[%s1298_s7 + $0x10] sm:$0xff] (%p31_p4) }
  0x13   : > { %v282_v2 = vld [vmem:[%s1298_s7 + $0x20] sm:$0xff] (%p31_p4)  ;;  %279 = vst [vmem:[%s1303_s8] sm:$0xff] (%p31_p4), %v278_v0  ;;  %281 = vst [vmem:[%s1303_s8 + $0x8] sm:$0xff] (%p31_p4), %v280_v1  ;;  %v284_v3 = vld [vmem:[%s1298_s7 + $0x30] sm:$0xff] (%p31_p4) }
  0x14   : > { %283 = vst [vmem:[%s1303_s8 + $0x10] sm:$0xff] %v282_v2  ;;  %v286_v4 = vld [vmem:[%s1298_s7 + $0x40] sm:$0xff]  ;;  %v288_v5 = vld [vmem:[%s1298_s7 + $0x50] sm:$0xff]  ;;  %285 = vst [vmem:[%s1303_s8 + $0x18] sm:$0xff] %v284_v3 }
  0x15   : > { %287 = vst [vmem:[%s1303_s8 + $0x20] sm:$0xff] %v286_v4  ;;  %289 = vst [vmem:[%s1303_s8 + $0x28] sm:$0xff] %v288_v5  ;;  %v290_v6 = vld [vmem:[%s1298_s7 + $0x60] sm:$0xff]  ;;  %v292_v7 = vld [vmem:[%s1298_s7 + $0x70] sm:$0xff] }
  0x16   : > { %v294_v8 = vld [vmem:[%s1298_s7 + $0x80] sm:$0xff]  ;;  %291 = vst [vmem:[%s1303_s8 + $0x30] sm:$0xff] %v290_v6  ;;  %293 = vst [vmem:[%s1303_s8 + $0x38] sm:$0xff] %v292_v7  ;;  %v296_v9 = vld [vmem:[%s1298_s7 + $0x90] sm:$0xff] }
  0x17   : > { %295 = vst [vmem:[%s1303_s8 + $0x40] sm:$0xff] %v294_v8  ;;  %v298_v10 = vld [vmem:[%s1298_s7 + $0xa0] sm:$0xff]  ;;  %v300_v11 = vld [vmem:[%s1298_s7 + $0xb0] sm:$0xff]  ;;  %297 = vst [vmem:[%s1303_s8 + $0x48] sm:$0xff] %v296_v9 }
  0x18   : > { %299 = vst [vmem:[%s1303_s8 + $0x50] sm:$0xff] %v298_v10  ;;  %301 = vst [vmem:[%s1303_s8 + $0x58] sm:$0xff] %v300_v11  ;;  %v302_v12 = vld [vmem:[%s1298_s7 + $0xc0] sm:$0xff]  ;;  %v304_v13 = vld [vmem:[%s1298_s7 + $0xd0] sm:$0xff] }
  0x19   : > { %v306_v14 = vld [vmem:[%s1298_s7 + $0xe0] sm:$0xff]  ;;  %303 = vst [vmem:[%s1303_s8 + $0x60] sm:$0xff] %v302_v12  ;;  %305 = vst [vmem:[%s1303_s8 + $0x68] sm:$0xff] %v304_v13  ;;  %v308_v15 = vld [vmem:[%s1298_s7 + $0xf0] sm:$0xff] }
  0x1a   : > { %307 = vst [vmem:[%s1303_s8 + $0x70] sm:$0xff] %v306_v14  ;;  %v310_v16 = vld [vmem:[%s1298_s7 + $0x100] sm:$0xff]  ;;  %v312_v17 = vld [vmem:[%s1298_s7 + $0x110] sm:$0xff]  ;;  %309 = vst [vmem:[%s1303_s8 + $0x78] sm:$0xff] %v308_v15 }
  0x1b   : > { %311 = vst [vmem:[%s1303_s8 + $0x80] sm:$0xff] %v310_v16  ;;  %313 = vst [vmem:[%s1303_s8 + $0x88] sm:$0xff] %v312_v17  ;;  %v314_v18 = vld [vmem:[%s1298_s7 + $0x120] sm:$0xff]  ;;  %v316_v19 = vld [vmem:[%s1298_s7 + $0x130] sm:$0xff] }
  0x1c   : > { %v318_v20 = vld [vmem:[%s1298_s7 + $0x140] sm:$0xff]  ;;  %315 = vst [vmem:[%s1303_s8 + $0x90] sm:$0xff] %v314_v18  ;;  %317 = vst [vmem:[%s1303_s8 + $0x98] sm:$0xff] %v316_v19  ;;  %v320_v21 = vld [vmem:[%s1298_s7 + $0x150] sm:$0xff] }
  0x1d   : > { %319 = vst [vmem:[%s1303_s8 + $0xa0] sm:$0xff] %v318_v20  ;;  %v322_v22 = vld [vmem:[%s1298_s7 + $0x160] sm:$0xff]  ;;  %v324_v23 = vld [vmem:[%s1298_s7 + $0x170] sm:$0xff]  ;;  %321 = vst [vmem:[%s1303_s8 + $0xa8] sm:$0xff] %v320_v21 }
  0x1e   : > { %323 = vst [vmem:[%s1303_s8 + $0xb0] sm:$0xff] %v322_v22  ;;  %325 = vst [vmem:[%s1303_s8 + $0xb8] sm:$0xff] %v324_v23  ;;  %v326_v24 = vld [vmem:[%s1298_s7 + $0x180] sm:$0xff]  ;;  %v328_v25 = vld [vmem:[%s1298_s7 + $0x190] sm:$0xff] }
  0x1f   : > { %v330_v26 = vld [vmem:[%s1298_s7 + $0x1a0] sm:$0xff]  ;;  %327 = vst [vmem:[%s1303_s8 + $0xc0] sm:$0xff] %v326_v24  ;;  %329 = vst [vmem:[%s1303_s8 + $0xc8] sm:$0xff] %v328_v25  ;;  %v332_v27 = vld [vmem:[%s1298_s7 + $0x1b0] sm:$0xff] }
  0x20   : > { %331 = vst [vmem:[%s1303_s8 + $0xd0] sm:$0xff] %v330_v26  ;;  %v334_v28 = vld [vmem:[%s1298_s7 + $0x1c0] sm:$0xff]  ;;  %v336_v29 = vld [vmem:[%s1298_s7 + $0x1d0] sm:$0xff]  ;;  %333 = vst [vmem:[%s1303_s8 + $0xd8] sm:$0xff] %v332_v27 }
  0x21   : > { %335 = vst [vmem:[%s1303_s8 + $0xe0] sm:$0xff] %v334_v28  ;;  %337 = vst [vmem:[%s1303_s8 + $0xe8] sm:$0xff] %v336_v29  ;;  %v338_v30 = vld [vmem:[%s1298_s7 + $0x1e0] sm:$0xff]  ;;  %v340_v31 = vld [vmem:[%s1298_s7 + $0x1f0] sm:$0xff] }
  0x22   : > { %339 = vst [vmem:[%s1303_s8 + $0xf0] sm:$0xff] %v338_v30  ;;  %341 = vst [vmem:[%s1303_s8 + $0xf8] sm:$0xff] %v340_v31 }
  0x23 PF: > { %p1050_p7 = scmp.ge.s32.totalorder %s1225_s20, 1  ;;  %p346_p8 = scmp.lt.s32.totalorder %s1225_s20, 3 }
  0x25   : > { %p347_p9 = pnand %p1050_p7, %p346_p8 }
  0x26   : > { %s353_s9 = sand.u32 (!%p347_p9), 1, %s1217_s18  }
  0x27   : > { %350 = sbr.rel (%p347_p9) target bundleno = 308 (0x134), region = 74  ;;  %s1051_s10 = sshll.u32 (!%p347_p9), %s353_s9, 8 }
  0x28   : > { %s1381_s15 = scalar_lea.vmem (!%p347_p9), [#allocation2], %s1051_s10  ;;  %s1052_s30 = sshll.u32 (!%p347_p9), %s353_s9, 6 }
  0x29   : > { %s1481_s18 = scalar_lea.vmem (!%p347_p9), [#allocation3], %s1052_s30 }
  0x2c   : > { %v1227_v32 = vmov 0   ;;  %v836_v33 = vld [vmem:[%s1526_s2 + $0x10] sm:$0xff]  ;;  %v834_v34 = vld [vmem:[%s1526_s2] sm:$0xff]  ;;  %vm444_vm0 = vcmask 523264   ;;  %v837_v62 = vld [vmem:[%s1526_s2 + $0x18] sm:$0xff]  ;;  %s1125_s9 = sshll.u32 (%p1288_p5), %s1043_s21, 4 }
  0x2d   : > { %483 = vmatprep.mubr.bf16.mxu0 %v1227_v32  ;;  %585 = vmatprep.mubr.bf16.mxu1 %v1227_v32  ;;  %v1153_v35 = vld [vmem:[%s1381_s15 + $0x34] ss:$8 sps:$4 sm:$0xff]   ;;  %v1157_v37 = vld [vmem:[%s1381_s15 + $0x30] ss:$8 sps:$4 sm:$0xff]   ;;  %v1159_v39 = vld [vmem:[%s1381_s15 + $0x24] ss:$8 sps:$4 sm:$0xff]   ;;  %s955_s8 = scalar_lea.vmem (%p1288_p5), %s1529_s5, %s1125_s9 }
  0x2e   : > { %1152 = vset.pattern.permute.xlu1 %v1227_v32  ;;  %1151 = vset.pattern.permute.xlu0 %v1227_v32  ;;  %v1155_v36 = vld [vmem:[%s1381_s15 + $0x74] ss:$8 sps:$4 sm:$0xff]   ;;  %v1158_v38 = vld [vmem:[%s1381_s15 + $0x70] ss:$8 sps:$4 sm:$0xff]   ;;  %v1161_v40 = vld [vmem:[%s1381_s15 + $0x64] ss:$8 sps:$4 sm:$0xff]  }
  0x2f   : > { %850 = vperm.xlu1 %1152, %v836_v33   ;;  %840 = vperm.xlu0 %1151, %v834_v34   ;;  %v1163_v41 = vld [vmem:[%s1381_s15 + $0x20] ss:$8 sps:$4 sm:$0xff]   ;;  %v1165_v43 = vld [vmem:[%s1381_s15 + $0x14] ss:$8 sps:$4 sm:$0xff]   ;;  %v1169_v45 = vld [vmem:[%s1381_s15 + $0x10] ss:$8 sps:$4 sm:$0xff]  }
  0x30   : > { %459 = vmatprep.subr.bf16.mxu0 %v1153_v35  ;;  %561 = vmatprep.subr.bf16.mxu1 %v1155_v36  ;;  %v1164_v42 = vld [vmem:[%s1381_s15 + $0x60] ss:$8 sps:$4 sm:$0xff]   ;;  %v1167_v44 = vld [vmem:[%s1381_s15 + $0x54] ss:$8 sps:$4 sm:$0xff]   ;;  %v1170_v46 = vld [vmem:[%s1381_s15 + $0x50] ss:$8 sps:$4 sm:$0xff]  }
  0x31   : > { %460 = vmatpush1.bf16.msra.mxu0 %v1157_v37  ;;  %562 = vmatpush1.bf16.msra.mxu1 %v1158_v38  ;;  %v1171_v47 = vld [vmem:[%s1381_s15 + $0x4] ss:$8 sps:$4 sm:$0xff]   ;;  %v1175_v49 = vld [vmem:[%s1381_s15] ss:$8 sps:$4 sm:$0xff]   ;;  %v1180_v51 = vld [vmem:[%s1381_s15 + $0xb4] ss:$8 sps:$4 sm:$0xff]  }
  0x32   : > { %461 = vmatprep.subr.bf16.mxu0 %v1159_v39  ;;  %563 = vmatprep.subr.bf16.mxu1 %v1161_v40  ;;  %v1173_v48 = vld [vmem:[%s1381_s15 + $0x44] ss:$8 sps:$4 sm:$0xff]   ;;  %v1176_v50 = vld [vmem:[%s1381_s15 + $0x40] ss:$8 sps:$4 sm:$0xff]   ;;  %v1183_v52 = vld [vmem:[%s1381_s15 + $0xf4] ss:$8 sps:$4 sm:$0xff]  }
  0x33   : > { %v1177_v53 = vld [vmem:[%s1525_s1] sm:$0xff]   ;;  %v1178_v54 = vld [vmem:[%s1381_s15 + $0xb0] ss:$8 sps:$4 sm:$0xff]   ;;  %v1193_v60 = vld [vmem:[%s1381_s15 + $0x94] ss:$8 sps:$4 sm:$0xff]   ;;  %855 = vperm.xlu1 %1152, %v837_v62  }
  0x34   : > { %v1181_v55 = vld [vmem:[%s1381_s15 + $0xf0] ss:$8 sps:$4 sm:$0xff]   ;;  %v1186_v56 = vld [vmem:[%s1381_s15 + $0xa4] ss:$8 sps:$4 sm:$0xff]   ;;  %v1184_v58 = vld [vmem:[%s1381_s15 + $0xa0] ss:$8 sps:$4 sm:$0xff]  }
  0x35   : > { %462 = vmatpush1.bf16.msra.mxu0 %v1163_v41  ;;  %564 = vmatpush1.bf16.msra.mxu1 %v1164_v42  ;;  %v1189_v57 = vld [vmem:[%s1381_s15 + $0xe4] ss:$8 sps:$4 sm:$0xff]   ;;  %v1187_v59 = vld [vmem:[%s1381_s15 + $0xe0] ss:$8 sps:$4 sm:$0xff]   ;;  %v1196_v61 = vld [vmem:[%s1381_s15 + $0xd4] ss:$8 sps:$4 sm:$0xff]  }
  0x36   : > { %463 = vmatprep.subr.bf16.mxu0 %v1165_v43  ;;  %565 = vmatprep.subr.bf16.mxu1 %v1167_v44  ;;  %v835_v63 = vld [vmem:[%s1526_s2 + $0x8] sm:$0xff]  ;;  %v1191_v1 = vld [vmem:[%s1381_s15 + $0x90] ss:$8 sps:$4 sm:$0xff]   ;;  %v874_v8 = vld [vmem:[%s1527_s3] sm:$0xff] }
  0x37   : > { %v1190_v0 = vld [vmem:[%s1525_s1 + $0x8] sm:$0xff]   ;;  %845 = vperm.xlu0 %1151, %v835_v63   ;;  %v1194_v2 = vld [vmem:[%s1381_s15 + $0xd0] ss:$8 sps:$4 sm:$0xff]   ;;  %v906_v12 = vld [vmem:[%s1528_s4] sm:$0xff] }
  0x38   : > { %v1199_v3 = vld [vmem:[%s1381_s15 + $0x84] ss:$8 sps:$4 sm:$0xff]   ;;  %v1197_v5 = vld [vmem:[%s1381_s15 + $0x80] ss:$8 sps:$4 sm:$0xff]   ;;  %v877_v9 = vld [vmem:[%s1527_s3 + $0x18] sm:$0xff] }
  0x39   : > { %464 = vmatpush1.bf16.msra.mxu0 %v1169_v45  ;;  %566 = vmatpush1.bf16.msra.mxu1 %v1170_v46  ;;  %v1202_v4 = vld [vmem:[%s1381_s15 + $0xc4] ss:$8 sps:$4 sm:$0xff]   ;;  %v1200_v6 = vld [vmem:[%s1381_s15 + $0xc0] ss:$8 sps:$4 sm:$0xff]   ;;  %v876_v10 = vld [vmem:[%s1527_s3 + $0x10] sm:$0xff] }
  0x3a   : > { %465 = vmatprep.subr.bf16.mxu0 %v1171_v47  ;;  %567 = vmatprep.subr.bf16.mxu1 %v1173_v48  ;;  %v875_v7 = vld [vmem:[%s1527_s3 + $0x8] sm:$0xff]  ;;  %v909_v13 = vld [vmem:[%s1528_s4 + $0x18] sm:$0xff]  ;;  %v908_v14 = vld [vmem:[%s1528_s4 + $0x10] sm:$0xff] }
  0x3b   : > { %885 = vperm.xlu1 %1152, %v875_v7   ;;  %880 = vperm.xlu0 %1151, %v874_v8   ;;  %v907_v11 = vld [vmem:[%s1528_s4 + $0x8] sm:$0xff] }
  0x3d   : > { %466 = vmatpush1.bf16.msra.mxu0 %v1175_v49  ;;  %568 = vmatpush1.bf16.msra.mxu1 %v1176_v50 }
  0x3e   : > { %671 = vmatprep.subr.bf16.mxu0 %v1180_v51  ;;  %781 = vmatprep.subr.bf16.mxu1 %v1183_v52 }
  0x3f   : > { %895 = vperm.xlu1 %1152, %v877_v9   ;;  %890 = vperm.xlu0 %1151, %v876_v10  }
  0x40   : > { %1063 = vmatmul.mubr.msk.bf16.vlgmr.msra.gmra.mxu0 %vm444_vm0, %v1177_v53  ;;  %1081 = vmatmul.mubr.msk.bf16.vlgmr.msra.gmra.mxu1 %vm444_vm0, %v1177_v53 }
  0x41   : > { %672 = vmatpush1.bf16.msra.mxu0 %v1178_v54  ;;  %782 = vmatpush1.bf16.msra.mxu1 %v1181_v55 }
  0x42   : > { %673 = vmatprep.subr.bf16.mxu0 %v1186_v56  ;;  %783 = vmatprep.subr.bf16.mxu1 %v1189_v57 }
  0x43   : > { %493 = vmatprep.mubr.bf16.mxu0 %v1227_v32  ;;  %595 = vmatprep.mubr.bf16.mxu1 %v1227_v32 }
  0x44   : > { %917 = vperm.xlu1 %1152, %v907_v11   ;;  %912 = vperm.xlu0 %1151, %v906_v12  }
  0x45   : > { %674 = vmatpush1.bf16.msra.mxu0 %v1184_v58  ;;  %784 = vmatpush1.bf16.msra.mxu1 %v1187_v59 }
  0x46   : > { %675 = vmatprep.subr.bf16.mxu0 %v1193_v60  ;;  %785 = vmatprep.subr.bf16.mxu1 %v1196_v61 }
  0x48   : > { %1064 = vmatmul.mubr.msk.bf16.gmra.mxu0 %vm444_vm0, %v1190_v0  ;;  %1082 = vmatmul.mubr.msk.bf16.gmra.mxu1 %vm444_vm0, %v1190_v0 }
  0x49   : > { %676 = vmatpush1.bf16.msra.mxu0 %v1191_v1  ;;  %786 = vmatpush1.bf16.msra.mxu1 %v1194_v2 }
  0x4a   : > { %677 = vmatprep.subr.bf16.mxu0 %v1199_v3  ;;  %787 = vmatprep.subr.bf16.mxu1 %v1202_v4 }
  0x4b   : > { %695 = vmatprep.mubr.bf16.mxu0 %v1227_v32  ;;  %805 = vmatprep.mubr.bf16.mxu1 %v1227_v32 }
  0x4c   : > { %927 = vperm.xlu1 %1152, %v909_v13   ;;  %922 = vperm.xlu0 %1151, %v908_v14  }
  0x4d   : > { %678 = vmatpush1.bf16.msra.mxu0 %v1197_v5  ;;  %788 = vmatpush1.bf16.msra.mxu1 %v1200_v6 }
  0x50   : > { %1099 = vmatmul.mubr.msk.bf16.vlgmr.msra.gmra.mxu0 %vm444_vm0, %v1177_v53  ;;  %1117 = vmatmul.mubr.msk.bf16.vlgmr.msra.gmra.mxu1 %vm444_vm0, %v1177_v53 }
  0x51   : > { %705 = vmatprep.mubr.bf16.mxu0 %v1227_v32  ;;  %815 = vmatprep.mubr.bf16.mxu1 %v1227_v32 }
  0x58   : > { %1100 = vmatmul.mubr.msk.bf16.gmra.mxu0 %vm444_vm0, %v1190_v0  ;;  %1118 = vmatmul.mubr.msk.bf16.gmra.mxu1 %vm444_vm0, %v1190_v0 }
  0xaa   : > { %v841_v17 = vpop.permute.xlu0 %840  ;;  %v1465_v22 = vpop.permute.xlu1 %850 }
  0xae   : > { %v1467_v30 = vpop.permute.xlu1 %855 }
  0xb2   : > { %v846_v25 = vpop.permute.xlu0 %845 }
  0xb6   : > { %v881_v33 = vpop.permute.xlu0 %880  ;;  %v886_v40 = vpop.permute.xlu1 %885 }
  0xba   : > { %v1473_v45 = vpop.permute.xlu0 %890  ;;  %v1475_v56 = vpop.permute.xlu1 %895 }
  0xbf   : > { %v913_v0 = vpop.permute.xlu0 %912 }
 0x100   : > { %v485_v15 = vpop.f32.mrf.mxu0  ;;  %v587_v16 = vpop.f32.mrf.mxu1 }
 0x101   : > { %v606_v36 = vmax.f32 %v485_v15, %v587_v16 }
 0x102   : > { %v487_v18 = vpop.f32.mrf.mxu0  ;;  %v589_v19 = vpop.f32.mrf.mxu1 }
 0x103   : > { %v607_v39 = vmax.f32 %v487_v18, %v589_v19 }
 0x104   : > { %v489_v20 = vpop.f32.mrf.mxu0  ;;  %v591_v21 = vpop.f32.mrf.mxu1 }
 0x105   : > { %v608_v44 = vmax.f32 %v489_v20, %v591_v21 }
 0x106   : > { %v491_v23 = vpop.f32.mrf.mxu0  ;;  %v593_v24 = vpop.f32.mrf.mxu1 }
 0x107   : > { %v609_v50 = vmax.f32 %v491_v23, %v593_v24  ;;  %v918_v24 = vpop.permute.xlu1 %917 }
 0x108   : > { %v495_v26 = vpop.f32.mrf.mxu0  ;;  %v597_v27 = vpop.f32.mrf.mxu1 }
 0x109   : > { %v610_v61 = vmax.f32 %v495_v26, %v597_v27 }
 0x10a   : > { %v497_v28 = vpop.f32.mrf.mxu0  ;;  %v599_v29 = vpop.f32.mrf.mxu1 }
 0x10b   : > { %v611_v5 = vmax.f32 %v497_v28, %v599_v29 }
 0x10c   : > { %v499_v31 = vpop.f32.mrf.mxu0  ;;  %v601_v32 = vpop.f32.mrf.mxu1 }
 0x10d   : > { %v612_v6 = vmax.f32 %v499_v31, %v601_v32 }
 0x10e   : > { %v1469_v34 = vpop.f32.mrf.mxu0  ;;  %v1471_v35 = vpop.f32.mrf.mxu1 }
 0x10f   : > { %v613_v14 = vmax.f32 %v1469_v34, %v1471_v35 }
 0x110   : > { %v697_v37 = vpop.f32.mrf.mxu0  ;;  %v807_v38 = vpop.f32.mrf.mxu1 }
 0x111   : > { %v716_v41 = vmax.f32 %v606_v36, %v697_v37 }
 0x112   : > { %v699_v42 = vpop.f32.mrf.mxu0  ;;  %v809_v43 = vpop.f32.mrf.mxu1 }
 0x113   : > { %v826_v46 = vmax.f32 %v716_v41, %v807_v38  ;;  %v717_v47 = vmax.f32 %v607_v39, %v699_v42  ;;  %v923_v42 = vpop.permute.xlu0 %922 }
 0x114   : > { %v701_v48 = vpop.f32.mrf.mxu0  ;;  %v811_v49 = vpop.f32.mrf.mxu1 }
 0x115   : > { %v858_v51 = vadd.f32 %v841_v17, %v826_v46  ;;  %v827_v52 = vmax.f32 %v717_v47, %v809_v43  ;;  %v718_v53 = vmax.f32 %v608_v44, %v701_v48  ;;  %v928_v48 = vpop.permute.xlu1 %927 }
 0x116   : > { %v703_v54 = vpop.f32.mrf.mxu0  ;;  %v813_v55 = vpop.f32.mrf.mxu1 }
 0x117   : > { %v866_v57 = vmax.f32 %v858_v51, 0.0  ;;  %v859_v58 = vadd.f32 %v841_v17, %v827_v52  ;;  %v828_v59 = vmax.f32 %v718_v53, %v811_v49  ;;  %v719_v60 = vmax.f32 %v609_v50, %v703_v54 }
 0x118   : > { %v707_v62 = vpop.f32.mrf.mxu0  ;;  %v817_v63 = vpop.f32.mrf.mxu1 }
 0x119   : > { %v898_v1 = vmul.f32 %v881_v33, %v866_v57  ;;  %v867_v2 = vmax.f32 %v859_v58, 0.0  ;;  %v860_v3 = vadd.f32 %v846_v25, %v828_v59  ;;  %v829_v4 = vmax.f32 %v719_v60, %v813_v55 }
 0x11a   : > { %v720_v7 = vmax.f32 %v610_v61, %v707_v62  ;;  %v709_v8 = vpop.f32.mrf.mxu0  ;;  %v819_v9 = vpop.f32.mrf.mxu1 }
 0x11b   : > { %v930_v10 = vadd.f32 %v913_v0, %v898_v1  ;;  %v899_v11 = vmul.f32 %v881_v33, %v867_v2  ;;  %v868_v12 = vmax.f32 %v860_v3, 0.0  ;;  %v861_v13 = vadd.f32 %v846_v25, %v829_v4 }
 0x11c   : > { %v830_v15 = vmax.f32 %v720_v7, %v817_v63  ;;  %v721_v16 = vmax.f32 %v611_v5, %v709_v8  ;;  %v711_v17 = vpop.f32.mrf.mxu0  ;;  %v821_v18 = vpop.f32.mrf.mxu1 }
 0x11d   : > { %938 = vst [vmem:[%s1481_s18] sm:$0xff] %v930_v10  ;;  %v931_v19 = vadd.f32 %v913_v0, %v899_v11  ;;  %v900_v20 = vmul.f32 %v886_v40, %v868_v12  ;;  %v869_v21 = vmax.f32 %v861_v13, 0.0  ;;  %v722_v23 = vmax.f32 %v612_v6, %v711_v17 }
 0x11e   : > { %v862_v25 = vadd.f32 %v1465_v22, %v830_v15  ;;  %v831_v26 = vmax.f32 %v721_v16, %v819_v9  ;;  %v713_v27 = vpop.f32.mrf.mxu0  ;;  %v823_v35 = vpop.f32.mrf.mxu1 }
 0x11f   : > { %939 = vst [vmem:[%s1481_s18 + $0x8] sm:$0xff] %v931_v19  ;;  %v932_v28 = vadd.f32 %v918_v24, %v900_v20  ;;  %v901_v29 = vmul.f32 %v886_v40, %v869_v21  ;;  %v832_v31 = vmax.f32 %v722_v23, %v821_v18  ;;  %v723_v32 = vmax.f32 %v613_v14, %v713_v27 }
 0x120   : > { %v870_v33 = vmax.f32 %v862_v25, 0.0  ;;  %v863_v34 = vadd.f32 %v1465_v22, %v831_v26 }
 0x121   : > { %940 = vst [vmem:[%s1481_s18 + $0x10] sm:$0xff] %v932_v28  ;;  %v933_v36 = vadd.f32 %v918_v24, %v901_v29  ;;  %v864_v37 = vadd.f32 %v1467_v30, %v832_v31  ;;  %v833_v38 = vmax.f32 %v723_v32, %v823_v35 }
 0x122   : > { %v902_v39 = vmul.f32 %v1473_v45, %v870_v33  ;;  %v871_v41 = vmax.f32 %v863_v34, 0.0 }
 0x123   : > { %941 = vst [vmem:[%s1481_s18 + $0x18] sm:$0xff] %v933_v36  ;;  %v872_v40 = vmax.f32 %v864_v37, 0.0  ;;  %v865_v43 = vadd.f32 %v1467_v30, %v833_v38 }
 0x124   : > { %v934_v44 = vadd.f32 %v923_v42, %v902_v39  ;;  %v903_v22 = vmul.f32 %v1473_v45, %v871_v41  ;;  %v968_v30 = vld [vmem:[%s1481_s18] sm:$0xff] (%p1288_p5) }
 0x125   : > { %v904_v46 = vmul.f32 %v1475_v56, %v872_v40  ;;  %v873_v47 = vmax.f32 %v865_v43, 0.0  ;;  %969 = vst [vmem:[%s955_s8] sm:$0xff] (%p1288_p5), %v968_v30 }
 0x126   : > { %942 = vst [vmem:[%s1481_s18 + $0x20] sm:$0xff] %v934_v44  ;;  %v935_v49 = vadd.f32 %v923_v42, %v903_v22  ;;  %v970_v45 = vld [vmem:[%s1481_s18 + $0x8] sm:$0xff] (%p1288_p5) }
 0x127   : > { %v936_v50 = vadd.f32 %v928_v48, %v904_v46  ;;  %v905_v51 = vmul.f32 %v1475_v56, %v873_v47  ;;  %952 = sbr.rel (!%p1288_p5) target bundleno = 308 (0x134), region = 82  ;;  %971 = vst [vmem:[%s955_s8 + $0x8] sm:$0xff] (%p1288_p5), %v970_v45 }
 0x128   : > { %943 = vst [vmem:[%s1481_s18 + $0x28] sm:$0xff] %v935_v49  ;;  %v972_v53 = vld [vmem:[%s1481_s18 + $0x10] sm:$0xff] (%p1288_p5) }
 0x129   : > { %944 = vst [vmem:[%s1481_s18 + $0x30] sm:$0xff] %v936_v50  ;;  %v937_v52 = vadd.f32 %v928_v48, %v905_v51  ;;  %973 = vst [vmem:[%s955_s8 + $0x20] sm:$0xff] (%p1288_p5), %v972_v53 }
 0x12a   : > { %v974_v54 = vld [vmem:[%s1481_s18 + $0x18] sm:$0xff] (%p1288_p5) }
 0x12b   : > { %945 = vst [vmem:[%s1481_s18 + $0x38] sm:$0xff] %v937_v52  ;;  %975 = vst [vmem:[%s955_s8 + $0x28] sm:$0xff] (%p1288_p5), %v974_v54 }
 0x12d   : > { %v976_v55 = vld [vmem:[%s1481_s18 + $0x20] sm:$0xff] }
 0x12e   : > { %977 = vst [vmem:[%s955_s8 + $0x40] sm:$0xff] %v976_v55 }
 0x12f   : > { %v978_v56 = vld [vmem:[%s1481_s18 + $0x28] sm:$0xff] }
 0x130   : > { %979 = vst [vmem:[%s955_s8 + $0x48] sm:$0xff] %v978_v56  ;;  %v980_v57 = vld [vmem:[%s1481_s18 + $0x30] sm:$0xff] }
 0x131   : > { %981 = vst [vmem:[%s955_s8 + $0x60] sm:$0xff] %v980_v57 }
 0x132   : > { %v982_v58 = vld [vmem:[%s1481_s18 + $0x38] sm:$0xff] }
 0x133   : > { %983 = vst [vmem:[%s955_s8 + $0x68] sm:$0xff] %v982_v58 }
 0x134 PF: > { %p12_p10 = scmp.ge.s32.totalorder %s1275_s22, 4   ;;  %s1531_s18 = smov %s1221_s19 }
 0x135   : > { %s1532_s19 = smov %s1286_s25  ;;  %s1533_s20 = smov %s1275_s22 }
 0x136   :  { %14 = sbr.rel (!%p12_p10) target bundleno = 2 (0x2), region = 139 }

// kernel: cnn_forward.11
= control target key start
LH: loop header
LB: loop body
LE: loop exit
PB: predicated region body
PF: predicated region fallthrough
CT: control target
= control target key end

     0   :  { %v840_v1 = vmov 0   ;;  %vm592_vm0 = vcmask 687104   ;;  %s1027_s0 = inlined_call_operand.vmem [shape: bf16[4,128,84], index: 0, kind: input, shape index: {}]   ;;  %s1028_s1 = inlined_call_operand.vmem [shape: bf16[32,128], index: 1, kind: input, shape index: {}]   ;;  %s1029_s2 = inlined_call_operand.vmem [shape: f32[32,1], index: 2, kind: input, shape index: {}]   ;;  %s1030_s3 = inlined_call_operand.vmem [shape: f32[32,1], index: 3, kind: input, shape index: {}]   ;;  %s1031_s4 = inlined_call_operand.vmem [shape: f32[32,1], index: 4, kind: input, shape index: {}]   ;;  %s1032_s5 = inlined_call_operand.vmem [shape: f32[32,84], index: 5, kind: output, shape index: {}]  }
   0x1   :  { %v806_v0 = vld [vmem:[%s1027_s0 + $0x38] sm:$0xff]   ;;  %805 = vset.pattern.permute.xlu1 %v840_v1  ;;  %804 = vset.pattern.permute.xlu0 %v840_v1  ;;  %v808_v3 = vld [vmem:[%s1027_s0 + $0x30] sm:$0xff]   ;;  %v810_v5 = vld [vmem:[%s1027_s0 + $0x28] sm:$0xff]  }
   0x2   :  { %v807_v2 = vld [vmem:[%s1027_s0 + $0x78] sm:$0xff]   ;;  %723 = vmatprep.subr.bf16.mxu0 %v806_v0  ;;  %v809_v4 = vld [vmem:[%s1027_s0 + $0x70] sm:$0xff]   ;;  %v811_v6 = vld [vmem:[%s1027_s0 + $0x68] sm:$0xff]  }
   0x3   :  { %743 = vmatprep.subr.bf16.mxu1 %v807_v2  ;;  %724 = vmatpush3.bf16.msra.mxu0 %v806_v0  ;;  %v812_v7 = vld [vmem:[%s1027_s0 + $0x20] sm:$0xff]   ;;  %v814_v9 = vld [vmem:[%s1027_s0 + $0x18] sm:$0xff]   ;;  %v816_v11 = vld [vmem:[%s1027_s0 + $0x10] sm:$0xff]  }
   0x4   :  { %744 = vmatpush3.bf16.msra.mxu1 %v807_v2  ;;  %725 = vmatprep.subr.bf16.mxu0 %v808_v3  ;;  %v813_v8 = vld [vmem:[%s1027_s0 + $0x60] sm:$0xff]   ;;  %v815_v10 = vld [vmem:[%s1027_s0 + $0x58] sm:$0xff]   ;;  %v817_v13 = vld [vmem:[%s1027_s0 + $0x50] sm:$0xff]  }
   0x5   :  { %745 = vmatprep.subr.bf16.mxu1 %v809_v4  ;;  %v822_v12 = vld [vmem:[%s1028_s1] sm:$0xff]   ;;  %v818_v14 = vld [vmem:[%s1027_s0 + $0x8] sm:$0xff]   ;;  %v824_v18 = vld [vmem:[%s1027_s0 + $0xb8] sm:$0xff]  }
   0x6   :  { %739 = vmatprep.mubr.bf16.mxu0 %v822_v12  ;;  %759 = vmatprep.mubr.bf16.mxu1 %v822_v12  ;;  %v819_v15 = vld [vmem:[%s1027_s0 + $0x48] sm:$0xff]   ;;  %v820_v16 = vld [vmem:[%s1027_s0] sm:$0xff]   ;;  %v825_v19 = vld [vmem:[%s1027_s0 + $0xf8] sm:$0xff]  }
   0x7   :  { %726 = vmatpush3.bf16.msra.mxu0 %v808_v3  ;;  %v821_v17 = vld [vmem:[%s1027_s0 + $0x40] sm:$0xff]   ;;  %v931_v20 = vld [vmem:[%s1028_s1 + $0x8] sm:$0xff]   ;;  %v826_v21 = vld [vmem:[%s1027_s0 + $0xb0] sm:$0xff]  }
   0x8   :  { %746 = vmatpush3.bf16.msra.mxu1 %v809_v4  ;;  %727 = vmatprep.subr.bf16.mxu0 %v810_v5  ;;  %v827_v22 = vld [vmem:[%s1027_s0 + $0xf0] sm:$0xff]   ;;  %v828_v24 = vld [vmem:[%s1027_s0 + $0xa8] sm:$0xff]   ;;  %v504_v25 = vld [vmem:[%s1029_s2] sm:$0xff] }
   0x9   :  { %747 = vmatprep.subr.bf16.mxu1 %v811_v6  ;;  %v506_v23 = vld [vmem:[%s1029_s2 + $0x10] sm:$0xff]  ;;  %v829_v26 = vld [vmem:[%s1027_s0 + $0xe8] sm:$0xff]   ;;  %510 = vperm.xlu0 %804, %v504_v25   ;;  %v507_v27 = vld [vmem:[%s1029_s2 + $0x18] sm:$0xff] }
   0xa   :  { %520 = vperm.xlu1 %805, %v506_v23   ;;  %v830_v28 = vld [vmem:[%s1027_s0 + $0xa0] sm:$0xff]   ;;  %v505_v29 = vld [vmem:[%s1029_s2 + $0x8] sm:$0xff]  ;;  %v832_v32 = vld [vmem:[%s1027_s0 + $0x98] sm:$0xff]  }
   0xb   :  { %728 = vmatpush3.bf16.msra.mxu0 %v810_v5  ;;  %v831_v30 = vld [vmem:[%s1027_s0 + $0xe0] sm:$0xff]   ;;  %v537_v31 = vld [vmem:[%s1030_s3 + $0x8] sm:$0xff]  ;;  %v833_v34 = vld [vmem:[%s1027_s0 + $0xd8] sm:$0xff]  }
   0xc   :  { %748 = vmatpush3.bf16.msra.mxu1 %v811_v6  ;;  %729 = vmatprep.subr.bf16.mxu0 %v812_v7  ;;  %v536_v33 = vld [vmem:[%s1030_s3] sm:$0xff]  ;;  %v539_v35 = vld [vmem:[%s1030_s3 + $0x18] sm:$0xff]  ;;  %v834_v36 = vld [vmem:[%s1027_s0 + $0x90] sm:$0xff]  }
   0xd   :  { %749 = vmatprep.subr.bf16.mxu1 %v813_v8  ;;  %515 = vperm.xlu0 %804, %v505_v29   ;;  %v538_v37 = vld [vmem:[%s1030_s3 + $0x10] sm:$0xff]  ;;  %v565_v39 = vld [vmem:[%s1031_s4 + $0x8] sm:$0xff]  ;;  %v564_v41 = vld [vmem:[%s1031_s4] sm:$0xff] }
   0xe   :  { %525 = vperm.xlu1 %805, %v507_v27   ;;  %v835_v38 = vld [vmem:[%s1027_s0 + $0xd0] sm:$0xff]   ;;  %v836_v40 = vld [vmem:[%s1027_s0 + $0x88] sm:$0xff]   ;;  %v567_v43 = vld [vmem:[%s1031_s4 + $0x18] sm:$0xff] }
   0xf   :  { %730 = vmatpush3.bf16.msra.mxu0 %v812_v7  ;;  %v837_v42 = vld [vmem:[%s1027_s0 + $0xc8] sm:$0xff]   ;;  %v838_v44 = vld [vmem:[%s1027_s0 + $0x80] sm:$0xff]   ;;  %v566_v45 = vld [vmem:[%s1031_s4 + $0x10] sm:$0xff] }
  0x10   :  { %750 = vmatpush3.bf16.msra.mxu1 %v813_v8  ;;  %731 = vmatprep.subr.bf16.mxu0 %v814_v9  ;;  %v839_v46 = vld [vmem:[%s1027_s0 + $0xc0] sm:$0xff]  }
  0x11   :  { %751 = vmatprep.subr.bf16.mxu1 %v815_v10  ;;  %542 = vperm.xlu0 %804, %v536_v33  }
  0x12   :  { %547 = vperm.xlu1 %805, %v537_v31  }
  0x13   :  { %732 = vmatpush3.bf16.msra.mxu0 %v814_v9 }
  0x14   :  { %752 = vmatpush3.bf16.msra.mxu1 %v815_v10  ;;  %733 = vmatprep.subr.bf16.mxu0 %v816_v11 }
  0x15   :  { %753 = vmatprep.subr.bf16.mxu1 %v817_v13  ;;  %552 = vperm.xlu0 %804, %v538_v37  }
  0x16   :  { %557 = vperm.xlu1 %805, %v539_v35  }
  0x17   :  { %734 = vmatpush3.bf16.msra.mxu0 %v816_v11 }
  0x18   :  { %754 = vmatpush3.bf16.msra.mxu1 %v817_v13  ;;  %735 = vmatprep.subr.bf16.mxu0 %v818_v14 }
  0x19   :  { %755 = vmatprep.subr.bf16.mxu1 %v819_v15  ;;  %570 = vperm.xlu0 %804, %v564_v41  }
  0x1a   :  { %575 = vperm.xlu1 %805, %v565_v39  }
  0x1b   :  { %736 = vmatpush3.bf16.msra.mxu0 %v818_v14 }
  0x1c   :  { %756 = vmatpush3.bf16.msra.mxu1 %v819_v15  ;;  %737 = vmatprep.subr.bf16.mxu0 %v820_v16 }
  0x1d   :  { %757 = vmatprep.subr.bf16.mxu1 %v821_v17  ;;  %580 = vperm.xlu0 %804, %v566_v45  }
  0x1e   :  { %585 = vperm.xlu1 %805, %v567_v43  }
  0x1f   :  { %738 = vmatpush3.bf16.msra.mxu0 %v820_v16 }
  0x20   :  { %758 = vmatpush3.bf16.msra.mxu1 %v821_v17  ;;  %763 = vmatprep.subr.bf16.mxu0 %v824_v18 }
  0x21   :  { %783 = vmatprep.subr.bf16.mxu1 %v825_v19 }
  0x22   :  { %740 = vmatmul.mubr.bf16.vlgmr.msra.gmra.mxu0 %v931_v20 }
  0x23   :  { %760 = vmatmul.mubr.bf16.vlgmr.msra.gmra.mxu1 %v931_v20  ;;  %764 = vmatpush3.bf16.msra.mxu0 %v824_v18 }
  0x24   :  { %784 = vmatpush3.bf16.msra.mxu1 %v825_v19  ;;  %765 = vmatprep.subr.bf16.mxu0 %v826_v21 }
  0x25   :  { %785 = vmatprep.subr.bf16.mxu1 %v827_v22  ;;  %779 = vmatprep.mubr.bf16.mxu0 %v822_v12 }
  0x26   :  { %799 = vmatprep.mubr.bf16.mxu1 %v822_v12 }
  0x27   :  { %766 = vmatpush3.bf16.msra.mxu0 %v826_v21 }
  0x28   :  { %786 = vmatpush3.bf16.msra.mxu1 %v827_v22  ;;  %767 = vmatprep.subr.bf16.mxu0 %v828_v24 }
  0x29   :  { %787 = vmatprep.subr.bf16.mxu1 %v829_v26 }
  0x2b   :  { %768 = vmatpush3.bf16.msra.mxu0 %v828_v24 }
  0x2c   :  { %788 = vmatpush3.bf16.msra.mxu1 %v829_v26  ;;  %769 = vmatprep.subr.bf16.mxu0 %v830_v28 }
  0x2d   :  { %789 = vmatprep.subr.bf16.mxu1 %v831_v30 }
  0x2f   :  { %770 = vmatpush3.bf16.msra.mxu0 %v830_v28 }
  0x30   :  { %790 = vmatpush3.bf16.msra.mxu1 %v831_v30  ;;  %771 = vmatprep.subr.bf16.mxu0 %v832_v32 }
  0x31   :  { %791 = vmatprep.subr.bf16.mxu1 %v833_v34 }
  0x33   :  { %772 = vmatpush3.bf16.msra.mxu0 %v832_v32 }
  0x34   :  { %792 = vmatpush3.bf16.msra.mxu1 %v833_v34  ;;  %773 = vmatprep.subr.bf16.mxu0 %v834_v36 }
  0x35   :  { %793 = vmatprep.subr.bf16.mxu1 %v835_v38 }
  0x37   :  { %774 = vmatpush3.bf16.msra.mxu0 %v834_v36 }
  0x38   :  { %794 = vmatpush3.bf16.msra.mxu1 %v835_v38  ;;  %775 = vmatprep.subr.bf16.mxu0 %v836_v40 }
  0x39   :  { %795 = vmatprep.subr.bf16.mxu1 %v837_v42 }
  0x3b   :  { %776 = vmatpush3.bf16.msra.mxu0 %v836_v40 }
  0x3c   :  { %796 = vmatpush3.bf16.msra.mxu1 %v837_v42  ;;  %777 = vmatprep.subr.bf16.mxu0 %v838_v44 }
  0x3d   :  { %797 = vmatprep.subr.bf16.mxu1 %v839_v46 }
  0x3f   :  { %778 = vmatpush3.bf16.msra.mxu0 %v838_v44 }
  0x40   :  { %798 = vmatpush3.bf16.msra.mxu1 %v839_v46 }
  0x42   :  { %780 = vmatmul.mubr.bf16.vlgmr.msra.gmra.mxu0 %v931_v20 }
  0x43   :  { %800 = vmatmul.mubr.bf16.vlgmr.msra.gmra.mxu1 %v931_v20 }
  0x84   :  { %v511_v47 = vpop.permute.xlu0 %510 }
  0x85   :  { %v521_v48 = vpop.permute.xlu1 %520 }
  0x88   :  { %v516_v50 = vpop.permute.xlu0 %515 }
  0x89   :  { %v526_v53 = vpop.permute.xlu1 %525 }
  0x8c   :  { %v543_v55 = vpop.permute.xlu0 %542 }
  0x8d   :  { %v548_v58 = vpop.permute.xlu1 %547 }
  0x90   :  { %v553_v60 = vpop.permute.xlu0 %552 }
  0x91   :  { %v558_v3 = vpop.permute.xlu1 %557 }
  0x94   :  { %v571_v9 = vpop.permute.xlu0 %570 }
  0x95   :  { %v576_v21 = vpop.permute.xlu1 %575 }
  0x98   :  { %v581_v27 = vpop.permute.xlu0 %580 }
  0x99   :  { %v586_v35 = vpop.permute.xlu1 %585 }
  0xe2   :  { %v741_v49 = vpop.f32.mrf.mxu0 }
  0xe3   :  { %v761_v51 = vpop.f32.mrf.mxu1 }
  0xe4   :  { %v135_v52 = vpop.f32.mrf.mxu0  ;;  %v266_v61 = vmax.f32 %v741_v49, %v761_v51 }
  0xe5   :  { %v249_v54 = vpop.f32.mrf.mxu1 }
  0xe6   :  { %v742_v56 = vpop.f32.mrf.mxu0  ;;  %v264_v0 = vmax.f32 %v135_v52, %v249_v54 }
  0xe7   :  { %v762_v57 = vpop.f32.mrf.mxu1 }
  0xe8   :  { %v138_v59 = vpop.f32.mrf.mxu0  ;;  %v267_v5 = vmax.f32 %v742_v56, %v762_v57 }
  0xe9   :  { %v252_v62 = vpop.f32.mrf.mxu1 }
  0xea   :  { %v265_v11 = vmax.f32 %v138_v59, %v252_v62 }
 0x102   :  { %v781_v63 = vpop.f32.mrf.mxu0 }
 0x103   :  { %v384_v1 = vmax.f32 %v266_v61, %v781_v63  ;;  %v801_v2 = vpop.f32.mrf.mxu1 }
 0x104   :  { %v367_v4 = vpop.f32.mrf.mxu0 }
 0x105   :  { %v502_v6 = vmax.f32 %v384_v1, %v801_v2  ;;  %v382_v7 = vmax.f32 %v264_v0, %v367_v4  ;;  %v485_v8 = vpop.f32.mrf.mxu1 }
 0x106   :  { %v782_v10 = vpop.f32.mrf.mxu0 }
 0x107   :  { %v530_v12 = vadd.f32 %v521_v48, %v502_v6  ;;  %v500_v13 = vmax.f32 %v382_v7, %v485_v8  ;;  %v385_v14 = vmax.f32 %v267_v5, %v782_v10  ;;  %v802_v15 = vpop.f32.mrf.mxu1 }
 0x108   :  { %v370_v16 = vpop.f32.mrf.mxu0 }
 0x109   :  { %v534_v17 = vmax.f32 %v530_v12, 0.0  ;;  %v528_v18 = vadd.f32 %v511_v47, %v500_v13  ;;  %v503_v19 = vmax.f32 %v385_v14, %v802_v15  ;;  %v383_v20 = vmax.f32 %v265_v11, %v370_v16  ;;  %v488_v22 = vpop.f32.mrf.mxu1 }
 0x10b   :  { %v562_v23 = vmul.f32 %v553_v60, %v534_v17  ;;  %v532_v24 = vmax.f32 %v528_v18, 0.0  ;;  %v531_v25 = vadd.f32 %v526_v53, %v503_v19  ;;  %v501_v26 = vmax.f32 %v383_v20, %v488_v22 }
 0x10d   :  { %v590_v28 = vadd.f32 %v581_v27, %v562_v23  ;;  %v560_v29 = vmul.f32 %v543_v55, %v532_v24  ;;  %v535_v30 = vmax.f32 %v531_v25, 0.0  ;;  %v529_v31 = vadd.f32 %v516_v50, %v501_v26 }
 0x10f   :  { %595 = vst.msk [vmem:[%s1032_s5 + $0x10] sm:$0xff] %vm592_vm0, %v590_v28  ;;  %v588_v32 = vadd.f32 %v571_v9, %v560_v29  ;;  %v563_v33 = vmul.f32 %v558_v3, %v535_v30  ;;  %v533_v34 = vmax.f32 %v529_v31, 0.0 }
 0x111   :  { %593 = vst.msk [vmem:[%s1032_s5] sm:$0xff] %vm592_vm0, %v588_v32  ;;  %v591_v36 = vadd.f32 %v586_v35, %v563_v33  ;;  %v561_v37 = vmul.f32 %v548_v58, %v533_v34 }
 0x113   :  { %596 = vst.msk [vmem:[%s1032_s5 + $0x18] sm:$0xff] %vm592_vm0, %v591_v36  ;;  %v589_v38 = vadd.f32 %v576_v21, %v561_v37 }
 0x115   :  { %594 = vst.msk [vmem:[%s1032_s5 + $0x8] sm:$0xff] %vm592_vm0, %v589_v38 }

</bundles_post_ra>
